<compile_context>
chip_gen: v7x
topology: tpu7x:2x2x1
jax: 0.10.0
libtpu: 0.0.40
codegen_flags: <defaults>
</compile_context>

<pallas_src>
import math

import jax
import jax.numpy as jnp
from jax.experimental import pallas as pl
from jax.experimental.pallas import tpu as pltpu

# ---------------- model hyper-parameters (small, self-consistent) ------------
B = 2               # batch
IMG_C = 3           # img_input_dim
IMG_H = IMG_W = 16  # image spatial
PATCH = 4           # patch size for the stand-in image feature extractor
N_IM = (IMG_H // PATCH) * (IMG_W // PATCH)     # 16 image tokens
PATCH_DIM = PATCH * PATCH * IMG_C              # 48

PC_IN = 4           # pc_input_dim (per-voxel feature dim)
N_PC = 16           # number of voxels per sample

VISUAL_DIM = 256    # image feature dim fed to fusion
LIDAR_DIM = 128     # lidar feature dim fed to fusion
D_ATTN = 128        # cfg.model.fusion.d_attn
NUM_HEADS = 4
HEAD_DIM = D_ATTN // NUM_HEADS                 # 32
OUT_DIM = 128       # cfg.model.fusion.d_embedding  (final descriptor size)
BN_EPS = 1e-5

K_PAD = 128         # lane-pad tiny contraction dims (48 / 4) to a full vreg width
BIAS_W = 256        # lane width of the packed bias block
BIAS_ROWS = 8

BN_INV_STD = 1.0 / math.sqrt(1.0 + BN_EPS)     # eval BN: running mean 0, var 1
ATTN_SCALE = 1.0 / math.sqrt(HEAD_DIM)


# ------------------------------- Pallas kernel --------------------------------
def umf_kernel(patches_ref, voxels_ref,
               w_img_ref, w_pc_ref, wq_ref, wkv_ref, wo_ref,
               w_fc1_ref, w_fc2_ref, bias_ref,
               out_ref):
    # packed biases: one (8, 256) f32 block, sliced at lane-aligned offsets
    biases = bias_ref[...]
    b_img = biases[0:1, :]                 # (1, VISUAL_DIM)
    b_kv = biases[1:2, :]                  # (1, 2*D_ATTN)
    b_pc = biases[2:3, :LIDAR_DIM]         # (1, LIDAR_DIM)
    b_q = biases[3:4, :D_ATTN]             # (1, D_ATTN)  (score scale pre-folded)
    b_o = biases[4:5, :D_ATTN]
    b_bn = biases[5:6, :OUT_DIM]           # BN beta (gamma/std folded into w_fc1)
    b_fc2 = biases[6:7, :OUT_DIM]

    # --- stand-in image feature extractor (patch embedding == conv-as-matmul) ---
    im_tok = jnp.dot(patches_ref[...], w_img_ref[...],
                     preferred_element_type=jnp.float32) + b_img
    im_tok = jnp.maximum(im_tok, 0.0).astype(jnp.bfloat16)      # (B*N_IM, VISUAL_DIM)

    # --- stand-in cloud feature extractor (per-voxel MLP) ---
    pc_tok = jnp.dot(voxels_ref[...], w_pc_ref[...],
                     preferred_element_type=jnp.float32) + b_pc
    pc_tok = jnp.maximum(pc_tok, 0.0).astype(jnp.bfloat16)      # (B*N_PC, LIDAR_DIM)

    # --- fusion encoder: multi-head cross attention (pc queries, img keys/vals) ---
    q = (jnp.dot(pc_tok, wq_ref[...],
                 preferred_element_type=jnp.float32) + b_q).astype(jnp.bfloat16)
    kv = jnp.dot(im_tok, wkv_ref[...],
                 preferred_element_type=jnp.float32) + b_kv      # (B*N_IM, 2*D_ATTN)
    k = kv[:, :D_ATTN].astype(jnp.bfloat16)
    v = kv[:, D_ATTN:].astype(jnp.bfloat16)

    # token-major -> (B, N, 128): bf16 vreg-aligned sublane split, done once
    q3 = q.reshape(B, N_PC, D_ATTN)
    k3 = k.reshape(B, N_IM, D_ATTN)
    v3 = v.reshape(B, N_IM, D_ATTN)

    head_outs = []
    for h in range(NUM_HEADS):                                   # static 4-way loop
        lo = h * HEAD_DIM
        q_h = q3[:, :, lo:lo + HEAD_DIM]                         # (B, N_PC, HEAD_DIM)
        k_h = k3[:, :, lo:lo + HEAD_DIM]                         # (B, N_IM, HEAD_DIM)
        v_h = v3[:, :, lo:lo + HEAD_DIM]
        # batched over samples so the two batch elements never mix
        s = jnp.einsum('bqd,bkd->bqk', q_h, k_h,
                       preferred_element_type=jnp.float32)       # (B, N_PC, N_IM)
        s = s - jnp.max(s, axis=-1, keepdims=True)
        p = jnp.exp(s)
        p = p * pl.reciprocal(jnp.sum(p, axis=-1, keepdims=True), approx=True)
        # mean pool over query tokens commutes with the (linear) value matmul:
        # mean_q(P @ V) == mean_q(P) @ V  -> one row per sample instead of N_PC
        p_mean = jnp.mean(p, axis=1, keepdims=True)              # (B, 1, N_IM)
        o_h = jnp.einsum('bqk,bkd->bqd', p_mean.astype(jnp.bfloat16), v_h,
                         preferred_element_type=jnp.float32)     # (B, 1, HEAD_DIM)
        head_outs.append(o_h.reshape(B, HEAD_DIM))
    fused = jnp.concatenate(head_outs, axis=-1)                  # (B, D_ATTN) f32

    attn_out = jnp.dot(fused.astype(jnp.bfloat16), wo_ref[...],
                       preferred_element_type=jnp.float32) + b_o  # (B, D_ATTN)

    # --- final block 'mlp': Linear(no bias) -> BN1d(folded) -> ReLU -> Linear ---
    h1 = jnp.dot(attn_out.astype(jnp.bfloat16), w_fc1_ref[...],
                 preferred_element_type=jnp.float32) + b_bn       # (B, OUT_DIM)
    h1 = jnp.maximum(h1, 0.0).astype(jnp.bfloat16)
    emb = jnp.dot(h1, w_fc2_ref[...],
                  preferred_element_type=jnp.float32) + b_fc2

    out_ref[...] = emb                                            # (B, OUT_DIM) f32


# --------------------------------- wrapper ------------------------------------
@jax.jit
def umfnet_forward(images_nchw, voxel_features, params):
    """images_nchw: (B, C, H, W) float32;  voxel_features: (B, N_PC, PC_IN) float32."""
    # glue: NCHW -> NHWC -> non-overlapping patches -> (B*N_IM, PATCH_DIM) -> pad to 128
    x = jnp.transpose(images_nchw, (0, 2, 3, 1))                   # NHWC
    x = x.reshape(B, IMG_H // PATCH, PATCH, IMG_W // PATCH, PATCH, IMG_C)
    x = jnp.transpose(x, (0, 1, 3, 2, 4, 5))                       # (B, h, w, P, P, C)
    patches = x.reshape(B * N_IM, PATCH_DIM)
    patches = jnp.pad(patches, ((0, 0), (0, K_PAD - PATCH_DIM))).astype(jnp.bfloat16)

    vox = voxel_features.reshape(B * N_PC, PC_IN)
    vox = jnp.pad(vox, ((0, 0), (0, K_PAD - PC_IN))).astype(jnp.bfloat16)

    # ---- fold / pack weights: bf16 MXU operands, BN affine and 1/sqrt(d) folded ----
    w_img = jnp.pad(params["w_img"], ((0, K_PAD - PATCH_DIM), (0, 0))).astype(jnp.bfloat16)
    w_pc = jnp.pad(params["w_pc"], ((0, K_PAD - PC_IN), (0, 0))).astype(jnp.bfloat16)
    wq = (params["wq"] * ATTN_SCALE).astype(jnp.bfloat16)
    wkv = jnp.concatenate([params["wk"], params["wv"]], axis=1).astype(jnp.bfloat16)
    wo = params["wo"].astype(jnp.bfloat16)
    w_fc1 = (params["w_fc1"] * (params["bn_g"] * BN_INV_STD)).astype(jnp.bfloat16)
    w_fc2 = params["w_fc2"].astype(jnp.bfloat16)

    def _row(vec):
        v = vec.reshape(-1).astype(jnp.float32)
        return jnp.pad(v, (0, BIAS_W - v.shape[0]))[None, :]

    bias_pack = jnp.concatenate([
        _row(params["b_img"]),
        _row(jnp.concatenate([params["bk"].reshape(-1), params["bv"].reshape(-1)])),
        _row(params["b_pc"]),
        _row(params["bq"] * ATTN_SCALE),
        _row(params["bo"]),
        _row(params["bn_b"]),
        _row(params["b_fc2"]),
        jnp.zeros((1, BIAS_W), jnp.float32),
    ], axis=0)                                                     # (8, 256) f32

    inputs = (patches, vox, w_img, w_pc, wq, wkv, wo, w_fc1, w_fc2, bias_pack)

    # whole problem fits trivially in VMEM -> gridless call, one fused step
    embedding = pl.pallas_call(
        umf_kernel,
        out_shape=jax.ShapeDtypeStruct((B, OUT_DIM), jnp.float32),
        in_specs=[pl.BlockSpec(memory_space=pltpu.MemorySpace.VMEM)] * len(inputs),
        out_specs=pl.BlockSpec(memory_space=pltpu.MemorySpace.VMEM),
    )(*inputs)

    return {"embedding": embedding}


# ------------------------ deterministic parameter init ------------------------
def init_params(key):
    def w(k, shape, scale=0.02):
        return (scale * jax.random.normal(k, shape)).astype(jnp.float32)

    ks = jax.random.split(key, 16)
    params = {
        # stand-in image patch embedding (conv as matmul): (in, out) layout
        "w_img": w(ks[0], (PATCH_DIM, VISUAL_DIM)),
        "b_img": jnp.zeros((1, VISUAL_DIM), jnp.float32),
        # stand-in per-voxel MLP
        "w_pc": w(ks[1], (PC_IN, LIDAR_DIM)),
        "b_pc": jnp.zeros((1, LIDAR_DIM), jnp.float32),
        # fusion encoder projections (nn.Linear weights stored transposed as (in, out))
        "wq": w(ks[2], (LIDAR_DIM, D_ATTN)),
        "bq": jnp.zeros((1, D_ATTN), jnp.float32),
        "wk": w(ks[3], (VISUAL_DIM, D_ATTN)),
        "bk": jnp.zeros((1, D_ATTN), jnp.float32),
        "wv": w(ks[4], (VISUAL_DIM, D_ATTN)),
        "bv": jnp.zeros((1, D_ATTN), jnp.float32),
        "wo": w(ks[5], (D_ATTN, D_ATTN)),
        "bo": jnp.zeros((1, D_ATTN), jnp.float32),
        # final block 'mlp'
        "w_fc1": w(ks[6], (D_ATTN, OUT_DIM)),          # bias=False
        "bn_g": jnp.ones((1, OUT_DIM), jnp.float32),   # BatchNorm1d affine (eval stats)
        "bn_b": jnp.zeros((1, OUT_DIM), jnp.float32),
        "w_fc2": w(ks[7], (OUT_DIM, OUT_DIM)),
        "b_fc2": jnp.zeros((1, OUT_DIM), jnp.float32),
    }
    return params


if __name__ == "__main__":
    key = jax.random.PRNGKey(0)
    k_img, k_vox, k_par = jax.random.split(key, 3)

    images = jax.random.normal(k_img, (B, IMG_C, IMG_H, IMG_W), dtype=jnp.float32)
    voxel_features = jax.random.normal(k_vox, (B, N_PC, PC_IN), dtype=jnp.float32)
    params = init_params(k_par)

    y = umfnet_forward(images, voxel_features, params)
    emb = jax.block_until_ready(y["embedding"])

    assert emb.shape == (B, OUT_DIM), emb.shape
    assert jnp.all(jnp.isfinite(emb))
    print("KERNEL_OK")
</pallas_src>

<mosaic_0001>
module attributes {stable_mosaic.version = 11 : i64} {
  func.func @umf_kernel(%arg0: memref<32x128xbf16, #tpu.memory_space<vmem>>, %arg1: memref<32x128xbf16, #tpu.memory_space<vmem>>, %arg2: memref<128x256xbf16, #tpu.memory_space<vmem>>, %arg3: memref<128x128xbf16, #tpu.memory_space<vmem>>, %arg4: memref<128x128xbf16, #tpu.memory_space<vmem>>, %arg5: memref<256x256xbf16, #tpu.memory_space<vmem>>, %arg6: memref<128x128xbf16, #tpu.memory_space<vmem>>, %arg7: memref<128x128xbf16, #tpu.memory_space<vmem>>, %arg8: memref<128x128xbf16, #tpu.memory_space<vmem>>, %arg9: memref<8x256xf32, #tpu.memory_space<vmem>>, %arg10: memref<2x128xf32, #tpu.memory_space<vmem>>) attributes {dimension_semantics = [], scalar_prefetch = 0 : i64, scratch_operands = 0 : i64, tpu.core_type = #tpu.core_type<tc>} {
    %c0 = arith.constant 0 : index
    %c0_0 = arith.constant 0 : index
    %0 = vector.load %arg9[%c0, %c0_0] : memref<8x256xf32, #tpu.memory_space<vmem>>, vector<8x256xf32>
    %1 = vector.extract_strided_slice %0 {offsets = [0, 0], sizes = [1, 256], strides = [1, 1]} : vector<8x256xf32> to vector<1x256xf32>
    %2 = vector.extract_strided_slice %0 {offsets = [1, 0], sizes = [1, 256], strides = [1, 1]} : vector<8x256xf32> to vector<1x256xf32>
    %3 = vector.extract_strided_slice %0 {offsets = [2, 0], sizes = [1, 128], strides = [1, 1]} : vector<8x256xf32> to vector<1x128xf32>
    %4 = vector.extract_strided_slice %0 {offsets = [3, 0], sizes = [1, 128], strides = [1, 1]} : vector<8x256xf32> to vector<1x128xf32>
    %5 = vector.extract_strided_slice %0 {offsets = [4, 0], sizes = [1, 128], strides = [1, 1]} : vector<8x256xf32> to vector<1x128xf32>
    %6 = vector.extract_strided_slice %0 {offsets = [5, 0], sizes = [1, 128], strides = [1, 1]} : vector<8x256xf32> to vector<1x128xf32>
    %7 = vector.extract_strided_slice %0 {offsets = [6, 0], sizes = [1, 128], strides = [1, 1]} : vector<8x256xf32> to vector<1x128xf32>
    %c0_1 = arith.constant 0 : index
    %c0_2 = arith.constant 0 : index
    %8 = vector.load %arg0[%c0_1, %c0_2] : memref<32x128xbf16, #tpu.memory_space<vmem>>, vector<32x128xbf16>
    %c0_3 = arith.constant 0 : index
    %c0_4 = arith.constant 0 : index
    %9 = vector.load %arg2[%c0_3, %c0_4] : memref<128x256xbf16, #tpu.memory_space<vmem>>, vector<128x256xbf16>
    %cst = arith.constant dense<0.000000e+00> : vector<32x256xf32>
    %10 = tpu.matmul %8, %9, %cst {dimension_numbers = #tpu.dot_dimension_numbers<[1], [0], [0], [1], [0, 0, 1, 1], [], []>} : vector<32x128xbf16>, vector<128x256xbf16>, vector<32x256xf32> -> vector<32x256xf32>
    %11 = vector.broadcast %1 : vector<1x256xf32> to vector<32x256xf32>
    %12 = arith.addf %10, %11 : vector<32x256xf32>
    %cst_5 = arith.constant 0.000000e+00 : f32
    %13 = vector.broadcast %cst_5 : f32 to vector<32x256xf32>
    %14 = arith.maximumf %12, %13 : vector<32x256xf32>
    %15 = arith.truncf %14 : vector<32x256xf32> to vector<32x256xbf16>
    %c0_6 = arith.constant 0 : index
    %c0_7 = arith.constant 0 : index
    %16 = vector.load %arg1[%c0_6, %c0_7] : memref<32x128xbf16, #tpu.memory_space<vmem>>, vector<32x128xbf16>
    %c0_8 = arith.constant 0 : index
    %c0_9 = arith.constant 0 : index
    %17 = vector.load %arg3[%c0_8, %c0_9] : memref<128x128xbf16, #tpu.memory_space<vmem>>, vector<128x128xbf16>
    %cst_10 = arith.constant dense<0.000000e+00> : vector<32x128xf32>
    %18 = tpu.matmul %16, %17, %cst_10 {dimension_numbers = #tpu.dot_dimension_numbers<[1], [0], [0], [1], [0, 0, 1, 1], [], []>} : vector<32x128xbf16>, vector<128x128xbf16>, vector<32x128xf32> -> vector<32x128xf32>
    %19 = vector.broadcast %3 : vector<1x128xf32> to vector<32x128xf32>
    %20 = arith.addf %18, %19 : vector<32x128xf32>
    %cst_11 = arith.constant 0.000000e+00 : f32
    %21 = vector.broadcast %cst_11 : f32 to vector<32x128xf32>
    %22 = arith.maximumf %20, %21 : vector<32x128xf32>
    %23 = arith.truncf %22 : vector<32x128xf32> to vector<32x128xbf16>
    %c0_12 = arith.constant 0 : index
    %c0_13 = arith.constant 0 : index
    %24 = vector.load %arg4[%c0_12, %c0_13] : memref<128x128xbf16, #tpu.memory_space<vmem>>, vector<128x128xbf16>
    %cst_14 = arith.constant dense<0.000000e+00> : vector<32x128xf32>
    %25 = tpu.matmul %23, %24, %cst_14 {dimension_numbers = #tpu.dot_dimension_numbers<[1], [0], [0], [1], [0, 0, 1, 1], [], []>} : vector<32x128xbf16>, vector<128x128xbf16>, vector<32x128xf32> -> vector<32x128xf32>
    %26 = vector.broadcast %4 : vector<1x128xf32> to vector<32x128xf32>
    %27 = arith.addf %25, %26 : vector<32x128xf32>
    %28 = arith.truncf %27 : vector<32x128xf32> to vector<32x128xbf16>
    %c0_15 = arith.constant 0 : index
    %c0_16 = arith.constant 0 : index
    %29 = vector.load %arg5[%c0_15, %c0_16] : memref<256x256xbf16, #tpu.memory_space<vmem>>, vector<256x256xbf16>
    %cst_17 = arith.constant dense<0.000000e+00> : vector<32x256xf32>
    %30 = tpu.matmul %15, %29, %cst_17 {dimension_numbers = #tpu.dot_dimension_numbers<[1], [0], [0], [1], [0, 0, 1, 1], [], []>} : vector<32x256xbf16>, vector<256x256xbf16>, vector<32x256xf32> -> vector<32x256xf32>
    %31 = vector.broadcast %2 : vector<1x256xf32> to vector<32x256xf32>
    %32 = arith.addf %30, %31 : vector<32x256xf32>
    %33 = vector.extract_strided_slice %32 {offsets = [0, 0], sizes = [32, 128], strides = [1, 1]} : vector<32x256xf32> to vector<32x128xf32>
    %34 = arith.truncf %33 : vector<32x128xf32> to vector<32x128xbf16>
    %35 = vector.extract_strided_slice %32 {offsets = [0, 128], sizes = [32, 128], strides = [1, 1]} : vector<32x256xf32> to vector<32x128xf32>
    %36 = arith.truncf %35 : vector<32x128xf32> to vector<32x128xbf16>
    %37 = vector.shape_cast %28 : vector<32x128xbf16> to vector<2x16x128xbf16>
    %38 = vector.shape_cast %34 : vector<32x128xbf16> to vector<2x16x128xbf16>
    %39 = vector.shape_cast %36 : vector<32x128xbf16> to vector<2x16x128xbf16>
    %40 = vector.extract_strided_slice %37 {offsets = [0, 0, 0], sizes = [2, 16, 32], strides = [1, 1, 1]} : vector<2x16x128xbf16> to vector<2x16x32xbf16>
    %41 = vector.extract_strided_slice %38 {offsets = [0, 0, 0], sizes = [2, 16, 32], strides = [1, 1, 1]} : vector<2x16x128xbf16> to vector<2x16x32xbf16>
    %42 = vector.extract_strided_slice %39 {offsets = [0, 0, 0], sizes = [2, 16, 32], strides = [1, 1, 1]} : vector<2x16x128xbf16> to vector<2x16x32xbf16>
    "tpu.trace_start"() <{level = 10 : i32, message = "bqd,bkd->bqk"}> : () -> ()
    %cst_18 = arith.constant dense<0.000000e+00> : vector<2x16x16xf32>
    %43 = tpu.matmul %40, %41, %cst_18 {dimension_numbers = #tpu.dot_dimension_numbers<[2], [2], [1], [1], [0, 0, 0, 1, 1, 1], [0], [0]>} : vector<2x16x32xbf16>, vector<2x16x32xbf16>, vector<2x16x16xf32> -> vector<2x16x16xf32>
    "tpu.trace_stop"() : () -> ()
    %cst_19 = arith.constant dense<0xFF800000> : vector<2x16xf32>
    %44 = vector.multi_reduction <maximumf>, %43, %cst_19 [2] : vector<2x16x16xf32> to vector<2x16xf32>
    %45 = vector.shape_cast %44 : vector<2x16xf32> to vector<2x16x1xf32>
    %46 = vector.broadcast %45 : vector<2x16x1xf32> to vector<2x16x16xf32>
    %47 = arith.subf %43, %46 : vector<2x16x16xf32>
    %48 = math.exp %47 : vector<2x16x16xf32>
    %cst_20 = arith.constant dense<0.000000e+00> : vector<2x16xf32>
    %49 = vector.multi_reduction <add>, %48, %cst_20 [2] : vector<2x16x16xf32> to vector<2x16xf32>
    %50 = vector.shape_cast %49 : vector<2x16xf32> to vector<2x16x1xf32>
    %51 = tpu.reciprocal %50 {approx = true} : vector<2x16x1xf32> -> vector<2x16x1xf32>
    %52 = vector.broadcast %51 : vector<2x16x1xf32> to vector<2x16x16xf32>
    %53 = arith.mulf %48, %52 : vector<2x16x16xf32>
    %cst_21 = arith.constant dense<0.000000e+00> : vector<2x16xf32>
    %54 = vector.multi_reduction <add>, %53, %cst_21 [1] : vector<2x16x16xf32> to vector<2x16xf32>
    %55 = vector.shape_cast %54 : vector<2x16xf32> to vector<2x1x16xf32>
    %cst_22 = arith.constant 1.600000e+01 : f32
    %56 = vector.broadcast %cst_22 : f32 to vector<2x1x16xf32>
    %57 = arith.divf %55, %56 : vector<2x1x16xf32>
    %58 = arith.truncf %57 : vector<2x1x16xf32> to vector<2x1x16xbf16>
    "tpu.trace_start"() <{level = 10 : i32, message = "bqk,bkd->bqd"}> : () -> ()
    %cst_23 = arith.constant dense<0.000000e+00> : vector<2x1x32xf32>
    %59 = tpu.matmul %58, %42, %cst_23 {dimension_numbers = #tpu.dot_dimension_numbers<[2], [1], [1], [2], [0, 0, 0, 1, 1, 2], [0], [0]>} : vector<2x1x16xbf16>, vector<2x16x32xbf16>, vector<2x1x32xf32> -> vector<2x1x32xf32>
    "tpu.trace_stop"() : () -> ()
    %60 = vector.shape_cast %59 : vector<2x1x32xf32> to vector<2x32xf32>
    %61 = vector.extract_strided_slice %37 {offsets = [0, 0, 32], sizes = [2, 16, 32], strides = [1, 1, 1]} : vector<2x16x128xbf16> to vector<2x16x32xbf16>
    %62 = vector.extract_strided_slice %38 {offsets = [0, 0, 32], sizes = [2, 16, 32], strides = [1, 1, 1]} : vector<2x16x128xbf16> to vector<2x16x32xbf16>
    %63 = vector.extract_strided_slice %39 {offsets = [0, 0, 32], sizes = [2, 16, 32], strides = [1, 1, 1]} : vector<2x16x128xbf16> to vector<2x16x32xbf16>
    "tpu.trace_start"() <{level = 10 : i32, message = "bqd,bkd->bqk"}> : () -> ()
    %cst_24 = arith.constant dense<0.000000e+00> : vector<2x16x16xf32>
    %64 = tpu.matmul %61, %62, %cst_24 {dimension_numbers = #tpu.dot_dimension_numbers<[2], [2], [1], [1], [0, 0, 0, 1, 1, 1], [0], [0]>} : vector<2x16x32xbf16>, vector<2x16x32xbf16>, vector<2x16x16xf32> -> vector<2x16x16xf32>
    "tpu.trace_stop"() : () -> ()
    %cst_25 = arith.constant dense<0xFF800000> : vector<2x16xf32>
    %65 = vector.multi_reduction <maximumf>, %64, %cst_25 [2] : vector<2x16x16xf32> to vector<2x16xf32>
    %66 = vector.shape_cast %65 : vector<2x16xf32> to vector<2x16x1xf32>
    %67 = vector.broadcast %66 : vector<2x16x1xf32> to vector<2x16x16xf32>
    %68 = arith.subf %64, %67 : vector<2x16x16xf32>
    %69 = math.exp %68 : vector<2x16x16xf32>
    %cst_26 = arith.constant dense<0.000000e+00> : vector<2x16xf32>
    %70 = vector.multi_reduction <add>, %69, %cst_26 [2] : vector<2x16x16xf32> to vector<2x16xf32>
    %71 = vector.shape_cast %70 : vector<2x16xf32> to vector<2x16x1xf32>
    %72 = tpu.reciprocal %71 {approx = true} : vector<2x16x1xf32> -> vector<2x16x1xf32>
    %73 = vector.broadcast %72 : vector<2x16x1xf32> to vector<2x16x16xf32>
    %74 = arith.mulf %69, %73 : vector<2x16x16xf32>
    %cst_27 = arith.constant dense<0.000000e+00> : vector<2x16xf32>
    %75 = vector.multi_reduction <add>, %74, %cst_27 [1] : vector<2x16x16xf32> to vector<2x16xf32>
    %76 = vector.shape_cast %75 : vector<2x16xf32> to vector<2x1x16xf32>
    %cst_28 = arith.constant 1.600000e+01 : f32
    %77 = vector.broadcast %cst_28 : f32 to vector<2x1x16xf32>
    %78 = arith.divf %76, %77 : vector<2x1x16xf32>
    %79 = arith.truncf %78 : vector<2x1x16xf32> to vector<2x1x16xbf16>
    "tpu.trace_start"() <{level = 10 : i32, message = "bqk,bkd->bqd"}> : () -> ()
    %cst_29 = arith.constant dense<0.000000e+00> : vector<2x1x32xf32>
    %80 = tpu.matmul %79, %63, %cst_29 {dimension_numbers = #tpu.dot_dimension_numbers<[2], [1], [1], [2], [0, 0, 0, 1, 1, 2], [0], [0]>} : vector<2x1x16xbf16>, vector<2x16x32xbf16>, vector<2x1x32xf32> -> vector<2x1x32xf32>
    "tpu.trace_stop"() : () -> ()
    %81 = vector.shape_cast %80 : vector<2x1x32xf32> to vector<2x32xf32>
    %82 = vector.extract_strided_slice %37 {offsets = [0, 0, 64], sizes = [2, 16, 32], strides = [1, 1, 1]} : vector<2x16x128xbf16> to vector<2x16x32xbf16>
    %83 = vector.extract_strided_slice %38 {offsets = [0, 0, 64], sizes = [2, 16, 32], strides = [1, 1, 1]} : vector<2x16x128xbf16> to vector<2x16x32xbf16>
    %84 = vector.extract_strided_slice %39 {offsets = [0, 0, 64], sizes = [2, 16, 32], strides = [1, 1, 1]} : vector<2x16x128xbf16> to vector<2x16x32xbf16>
    "tpu.trace_start"() <{level = 10 : i32, message = "bqd,bkd->bqk"}> : () -> ()
    %cst_30 = arith.constant dense<0.000000e+00> : vector<2x16x16xf32>
    %85 = tpu.matmul %82, %83, %cst_30 {dimension_numbers = #tpu.dot_dimension_numbers<[2], [2], [1], [1], [0, 0, 0, 1, 1, 1], [0], [0]>} : vector<2x16x32xbf16>, vector<2x16x32xbf16>, vector<2x16x16xf32> -> vector<2x16x16xf32>
    "tpu.trace_stop"() : () -> ()
    %cst_31 = arith.constant dense<0xFF800000> : vector<2x16xf32>
    %86 = vector.multi_reduction <maximumf>, %85, %cst_31 [2] : vector<2x16x16xf32> to vector<2x16xf32>
    %87 = vector.shape_cast %86 : vector<2x16xf32> to vector<2x16x1xf32>
    %88 = vector.broadcast %87 : vector<2x16x1xf32> to vector<2x16x16xf32>
    %89 = arith.subf %85, %88 : vector<2x16x16xf32>
    %90 = math.exp %89 : vector<2x16x16xf32>
    %cst_32 = arith.constant dense<0.000000e+00> : vector<2x16xf32>
    %91 = vector.multi_reduction <add>, %90, %cst_32 [2] : vector<2x16x16xf32> to vector<2x16xf32>
    %92 = vector.shape_cast %91 : vector<2x16xf32> to vector<2x16x1xf32>
    %93 = tpu.reciprocal %92 {approx = true} : vector<2x16x1xf32> -> vector<2x16x1xf32>
    %94 = vector.broadcast %93 : vector<2x16x1xf32> to vector<2x16x16xf32>
    %95 = arith.mulf %90, %94 : vector<2x16x16xf32>
    %cst_33 = arith.constant dense<0.000000e+00> : vector<2x16xf32>
    %96 = vector.multi_reduction <add>, %95, %cst_33 [1] : vector<2x16x16xf32> to vector<2x16xf32>
    %97 = vector.shape_cast %96 : vector<2x16xf32> to vector<2x1x16xf32>
    %cst_34 = arith.constant 1.600000e+01 : f32
    %98 = vector.broadcast %cst_34 : f32 to vector<2x1x16xf32>
    %99 = arith.divf %97, %98 : vector<2x1x16xf32>
    %100 = arith.truncf %99 : vector<2x1x16xf32> to vector<2x1x16xbf16>
    "tpu.trace_start"() <{level = 10 : i32, message = "bqk,bkd->bqd"}> : () -> ()
    %cst_35 = arith.constant dense<0.000000e+00> : vector<2x1x32xf32>
    %101 = tpu.matmul %100, %84, %cst_35 {dimension_numbers = #tpu.dot_dimension_numbers<[2], [1], [1], [2], [0, 0, 0, 1, 1, 2], [0], [0]>} : vector<2x1x16xbf16>, vector<2x16x32xbf16>, vector<2x1x32xf32> -> vector<2x1x32xf32>
    "tpu.trace_stop"() : () -> ()
    %102 = vector.shape_cast %101 : vector<2x1x32xf32> to vector<2x32xf32>
    %103 = vector.extract_strided_slice %37 {offsets = [0, 0, 96], sizes = [2, 16, 32], strides = [1, 1, 1]} : vector<2x16x128xbf16> to vector<2x16x32xbf16>
    %104 = vector.extract_strided_slice %38 {offsets = [0, 0, 96], sizes = [2, 16, 32], strides = [1, 1, 1]} : vector<2x16x128xbf16> to vector<2x16x32xbf16>
    %105 = vector.extract_strided_slice %39 {offsets = [0, 0, 96], sizes = [2, 16, 32], strides = [1, 1, 1]} : vector<2x16x128xbf16> to vector<2x16x32xbf16>
    "tpu.trace_start"() <{level = 10 : i32, message = "bqd,bkd->bqk"}> : () -> ()
    %cst_36 = arith.constant dense<0.000000e+00> : vector<2x16x16xf32>
    %106 = tpu.matmul %103, %104, %cst_36 {dimension_numbers = #tpu.dot_dimension_numbers<[2], [2], [1], [1], [0, 0, 0, 1, 1, 1], [0], [0]>} : vector<2x16x32xbf16>, vector<2x16x32xbf16>, vector<2x16x16xf32> -> vector<2x16x16xf32>
    "tpu.trace_stop"() : () -> ()
    %cst_37 = arith.constant dense<0xFF800000> : vector<2x16xf32>
    %107 = vector.multi_reduction <maximumf>, %106, %cst_37 [2] : vector<2x16x16xf32> to vector<2x16xf32>
    %108 = vector.shape_cast %107 : vector<2x16xf32> to vector<2x16x1xf32>
    %109 = vector.broadcast %108 : vector<2x16x1xf32> to vector<2x16x16xf32>
    %110 = arith.subf %106, %109 : vector<2x16x16xf32>
    %111 = math.exp %110 : vector<2x16x16xf32>
    %cst_38 = arith.constant dense<0.000000e+00> : vector<2x16xf32>
    %112 = vector.multi_reduction <add>, %111, %cst_38 [2] : vector<2x16x16xf32> to vector<2x16xf32>
    %113 = vector.shape_cast %112 : vector<2x16xf32> to vector<2x16x1xf32>
    %114 = tpu.reciprocal %113 {approx = true} : vector<2x16x1xf32> -> vector<2x16x1xf32>
    %115 = vector.broadcast %114 : vector<2x16x1xf32> to vector<2x16x16xf32>
    %116 = arith.mulf %111, %115 : vector<2x16x16xf32>
    %cst_39 = arith.constant dense<0.000000e+00> : vector<2x16xf32>
    %117 = vector.multi_reduction <add>, %116, %cst_39 [1] : vector<2x16x16xf32> to vector<2x16xf32>
    %118 = vector.shape_cast %117 : vector<2x16xf32> to vector<2x1x16xf32>
    %cst_40 = arith.constant 1.600000e+01 : f32
    %119 = vector.broadcast %cst_40 : f32 to vector<2x1x16xf32>
    %120 = arith.divf %118, %119 : vector<2x1x16xf32>
    %121 = arith.truncf %120 : vector<2x1x16xf32> to vector<2x1x16xbf16>
    "tpu.trace_start"() <{level = 10 : i32, message = "bqk,bkd->bqd"}> : () -> ()
    %cst_41 = arith.constant dense<0.000000e+00> : vector<2x1x32xf32>
    %122 = tpu.matmul %121, %105, %cst_41 {dimension_numbers = #tpu.dot_dimension_numbers<[2], [1], [1], [2], [0, 0, 0, 1, 1, 2], [0], [0]>} : vector<2x1x16xbf16>, vector<2x16x32xbf16>, vector<2x1x32xf32> -> vector<2x1x32xf32>
    "tpu.trace_stop"() : () -> ()
    %123 = vector.shape_cast %122 : vector<2x1x32xf32> to vector<2x32xf32>
    %124 = tpu.concatenate %60, %81, %102, %123 in 1 : vector<2x32xf32>, vector<2x32xf32>, vector<2x32xf32>, vector<2x32xf32> -> vector<2x128xf32>
    %125 = arith.truncf %124 : vector<2x128xf32> to vector<2x128xbf16>
    %c0_42 = arith.constant 0 : index
    %c0_43 = arith.constant 0 : index
    %126 = vector.load %arg6[%c0_42, %c0_43] : memref<128x128xbf16, #tpu.memory_space<vmem>>, vector<128x128xbf16>
    %cst_44 = arith.constant dense<0.000000e+00> : vector<2x128xf32>
    %127 = tpu.matmul %125, %126, %cst_44 {dimension_numbers = #tpu.dot_dimension_numbers<[1], [0], [0], [1], [0, 0, 1, 1], [], []>} : vector<2x128xbf16>, vector<128x128xbf16>, vector<2x128xf32> -> vector<2x128xf32>
    %128 = vector.broadcast %5 : vector<1x128xf32> to vector<2x128xf32>
    %129 = arith.addf %127, %128 : vector<2x128xf32>
    %130 = arith.truncf %129 : vector<2x128xf32> to vector<2x128xbf16>
    %c0_45 = arith.constant 0 : index
    %c0_46 = arith.constant 0 : index
    %131 = vector.load %arg7[%c0_45, %c0_46] : memref<128x128xbf16, #tpu.memory_space<vmem>>, vector<128x128xbf16>
    %cst_47 = arith.constant dense<0.000000e+00> : vector<2x128xf32>
    %132 = tpu.matmul %130, %131, %cst_47 {dimension_numbers = #tpu.dot_dimension_numbers<[1], [0], [0], [1], [0, 0, 1, 1], [], []>} : vector<2x128xbf16>, vector<128x128xbf16>, vector<2x128xf32> -> vector<2x128xf32>
    %133 = vector.broadcast %6 : vector<1x128xf32> to vector<2x128xf32>
    %134 = arith.addf %132, %133 : vector<2x128xf32>
    %cst_48 = arith.constant 0.000000e+00 : f32
    %135 = vector.broadcast %cst_48 : f32 to vector<2x128xf32>
    %136 = arith.maximumf %134, %135 : vector<2x128xf32>
    %137 = arith.truncf %136 : vector<2x128xf32> to vector<2x128xbf16>
    %c0_49 = arith.constant 0 : index
    %c0_50 = arith.constant 0 : index
    %138 = vector.load %arg8[%c0_49, %c0_50] : memref<128x128xbf16, #tpu.memory_space<vmem>>, vector<128x128xbf16>
    %cst_51 = arith.constant dense<0.000000e+00> : vector<2x128xf32>
    %139 = tpu.matmul %137, %138, %cst_51 {dimension_numbers = #tpu.dot_dimension_numbers<[1], [0], [0], [1], [0, 0, 1, 1], [], []>} : vector<2x128xbf16>, vector<128x128xbf16>, vector<2x128xf32> -> vector<2x128xf32>
    %140 = vector.broadcast %7 : vector<1x128xf32> to vector<2x128xf32>
    %141 = arith.addf %139, %140 : vector<2x128xf32>
    %c0_52 = arith.constant 0 : index
    %c0_53 = arith.constant 0 : index
    %142 = vector.load %arg10[%c0_52, %c0_53] : memref<2x128xf32, #tpu.memory_space<vmem>>, vector<2x128xf32>
    tpu.vector_store %arg10[%c0_52, %c0_53], %141 {strides = array<i32>} : memref<2x128xf32, #tpu.memory_space<vmem>>, vector<2x128xf32>,
    return
  }
}

</mosaic_0001>

<bundles_post_ra>
// kernel: umfnet_forward.1
= control target key start
LH: loop header
LB: loop body
LE: loop exit
PB: predicated region body
PF: predicated region fallthrough
CT: control target
= control target key end

     0   :  { %v2744_v2 = vmov 0   ;;  %s3336_s0 = inlined_call_operand.vmem [shape: bf16[32,128], index: 0, kind: input, shape index: {}]   ;;  %s3337_s1 = inlined_call_operand.vmem [shape: bf16[32,128], index: 1, kind: input, shape index: {}]   ;;  %s3338_s2 = inlined_call_operand.vmem [shape: bf16[128,256], index: 2, kind: input, shape index: {}]   ;;  %s3339_s3 = inlined_call_operand.vmem [shape: bf16[128,128], index: 3, kind: input, shape index: {}]   ;;  %s3340_s4 = inlined_call_operand.vmem [shape: bf16[128,128], index: 4, kind: input, shape index: {}]   ;;  %s3341_s5 = inlined_call_operand.vmem [shape: bf16[256,256], index: 5, kind: input, shape index: {}]   ;;  %s3342_s6 = inlined_call_operand.vmem [shape: bf16[128,128], index: 6, kind: input, shape index: {}]   ;;  %s3343_s7 = inlined_call_operand.vmem [shape: bf16[128,128], index: 7, kind: input, shape index: {}]   ;;  %s3344_s8 = inlined_call_operand.vmem [shape: bf16[128,128], index: 8, kind: input, shape index: {}]   ;;  %s3345_s9 = inlined_call_operand.vmem [shape: f32[8,256], index: 9, kind: input, shape index: {}]   ;;  %s3346_s10 = inlined_call_operand.hbm [shape: f32[2,128], index: 10, kind: output, shape index: {}]  }
   0x1   :  { %v2539_v0 = vld [vmem:[%s3338_s2 + $0x4] ss:$8 sps:$4 sm:$0xff]   ;;  %191 = vmatprep.mubr.bf16.mxu0 %v2744_v2  ;;  %v2542_v3 = vld [vmem:[%s3338_s2] ss:$8 sps:$4 sm:$0xff]   ;;  %v2543_v4 = vld [vmem:[%s3338_s2 + $0x14] ss:$8 sps:$4 sm:$0xff]  }
   0x2   :  { %v2541_v1 = vld [vmem:[%s3339_s3] sm:$0xff]   ;;  %159 = vmatprep.subr.bf16.mxu0 %v2539_v0  ;;  %v2545_v5 = vld [vmem:[%s3339_s3 + $0x8] sm:$0xff]   ;;  %v2546_v6 = vld [vmem:[%s3338_s2 + $0x10] ss:$8 sps:$4 sm:$0xff]  }
   0x3   :  { %2336 = vmatprep.subr.bf16.mxu1 %v2541_v1  ;;  %160 = vmatpush1.bf16.msra.mxu0 %v2542_v3  ;;  %v2547_v7 = vld [vmem:[%s3338_s2 + $0x24] ss:$8 sps:$4 sm:$0xff]   ;;  %v2549_v8 = vld [vmem:[%s3339_s3 + $0x10] sm:$0xff]   ;;  %v2550_v9 = vld [vmem:[%s3338_s2 + $0x20] ss:$8 sps:$4 sm:$0xff]  }
   0x4   :  { %2337 = vmatpush3.bf16.msra.mxu1 %v2541_v1  ;;  %161 = vmatprep.subr.bf16.mxu0 %v2543_v4  ;;  %v2551_v10 = vld [vmem:[%s3338_s2 + $0x34] ss:$8 sps:$4 sm:$0xff]   ;;  %v2554_v12 = vld [vmem:[%s3338_s2 + $0x30] ss:$8 sps:$4 sm:$0xff]   ;;  %v2555_v13 = vld [vmem:[%s3338_s2 + $0x44] ss:$8 sps:$4 sm:$0xff]  }
   0x5   :  { %2338 = vmatprep.subr.bf16.mxu1 %v2545_v5  ;;  %v2553_v11 = vld [vmem:[%s3339_s3 + $0x18] sm:$0xff]   ;;  %v2557_v14 = vld [vmem:[%s3339_s3 + $0x20] sm:$0xff]   ;;  %v2561_v17 = vld [vmem:[%s3339_s3 + $0x28] sm:$0xff]  }
   0x6   :  { %v2558_v15 = vld [vmem:[%s3338_s2 + $0x40] ss:$8 sps:$4 sm:$0xff]   ;;  %v2559_v16 = vld [vmem:[%s3338_s2 + $0x54] ss:$8 sps:$4 sm:$0xff]   ;;  %v2562_v18 = vld [vmem:[%s3338_s2 + $0x50] ss:$8 sps:$4 sm:$0xff]  }
   0x7   :  { %162 = vmatpush1.bf16.msra.mxu0 %v2546_v6  ;;  %v2571_v19 = vld [vmem:[%s3337_s1] sm:$0xff]   ;;  %v2565_v21 = vld [vmem:[%s3339_s3 + $0x30] sm:$0xff]   ;;  %v2569_v24 = vld [vmem:[%s3339_s3 + $0x38] sm:$0xff]  }
   0x8   :  { %2339 = vmatpush3.bf16.msra.mxu1 %v2545_v5  ;;  %163 = vmatprep.subr.bf16.mxu0 %v2547_v7  ;;  %v2563_v20 = vld [vmem:[%s3338_s2 + $0x64] ss:$8 sps:$4 sm:$0xff]   ;;  %v2566_v22 = vld [vmem:[%s3338_s2 + $0x60] ss:$8 sps:$4 sm:$0xff]   ;;  %v2567_v23 = vld [vmem:[%s3338_s2 + $0x74] ss:$8 sps:$4 sm:$0xff]  }
   0x9   :  { %2340 = vmatprep.subr.bf16.mxu1 %v2549_v8  ;;  %2352 = vmatprep.mubr.bf16.mxu1 %v2571_v19  ;;  %v2570_v25 = vld [vmem:[%s3338_s2 + $0x70] ss:$8 sps:$4 sm:$0xff]   ;;  %v2577_v26 = vld [vmem:[%s3341_s5 + $0x4] ss:$8 sps:$4 sm:$0xff]   ;;  %v2575_v29 = vld [vmem:[%s3341_s5] ss:$8 sps:$4 sm:$0xff]  }
   0xa   :  { %v2572_v27 = vld [vmem:[%s3336_s0] sm:$0xff]   ;;  %v2573_v28 = vld [vmem:[%s3337_s1 + $0x8] sm:$0xff]   ;;  %v2580_v30 = vld [vmem:[%s3341_s5 + $0x14] ss:$8 sps:$4 sm:$0xff]  }
   0xb   :  { %164 = vmatpush1.bf16.msra.mxu0 %v2550_v9  ;;  %v2599_v31 = vld [vmem:[%s3340_s4] sm:$0xff]   ;;  %v2578_v32 = vld [vmem:[%s3341_s5 + $0x10] ss:$8 sps:$4 sm:$0xff]   ;;  %v2603_v33 = vld [vmem:[%s3340_s4 + $0x8] sm:$0xff]  }
   0xc   :  { %2341 = vmatpush3.bf16.msra.mxu1 %v2549_v8  ;;  %165 = vmatprep.subr.bf16.mxu0 %v2551_v10  ;;  %v2583_v34 = vld [vmem:[%s3341_s5 + $0x24] ss:$8 sps:$4 sm:$0xff]   ;;  %v2607_v36 = vld [vmem:[%s3340_s4 + $0x10] sm:$0xff]   ;;  %v2581_v37 = vld [vmem:[%s3341_s5 + $0x20] ss:$8 sps:$4 sm:$0xff]  }
   0xd   :  { %2342 = vmatprep.subr.bf16.mxu1 %v2553_v11  ;;  %v2574_v35 = vld [vmem:[%s3336_s0 + $0x8] sm:$0xff]   ;;  %v2586_v38 = vld [vmem:[%s3341_s5 + $0x34] ss:$8 sps:$4 sm:$0xff]   ;;  %v2584_v40 = vld [vmem:[%s3341_s5 + $0x30] ss:$8 sps:$4 sm:$0xff]  }
   0xe   :  { %v2611_v39 = vld [vmem:[%s3340_s4 + $0x18] sm:$0xff]   ;;  %v2589_v41 = vld [vmem:[%s3341_s5 + $0x44] ss:$8 sps:$4 sm:$0xff]   ;;  %v2587_v42 = vld [vmem:[%s3341_s5 + $0x40] ss:$8 sps:$4 sm:$0xff]  }
   0xf   :  { %166 = vmatpush1.bf16.msra.mxu0 %v2554_v12  ;;  %v2592_v43 = vld [vmem:[%s3341_s5 + $0x54] ss:$8 sps:$4 sm:$0xff]   ;;  %v2615_v44 = vld [vmem:[%s3340_s4 + $0x20] sm:$0xff]   ;;  %v2619_v45 = vld [vmem:[%s3340_s4 + $0x28] sm:$0xff]  }
  0x10   :  { %2343 = vmatpush3.bf16.msra.mxu1 %v2553_v11  ;;  %167 = vmatprep.subr.bf16.mxu0 %v2555_v13  ;;  %v2590_v46 = vld [vmem:[%s3341_s5 + $0x50] ss:$8 sps:$4 sm:$0xff]   ;;  %v2595_v47 = vld [vmem:[%s3341_s5 + $0x64] ss:$8 sps:$4 sm:$0xff]   ;;  %v2593_v48 = vld [vmem:[%s3341_s5 + $0x60] ss:$8 sps:$4 sm:$0xff]  }
  0x11   :  { %2344 = vmatprep.subr.bf16.mxu1 %v2557_v14  ;;  %v2598_v49 = vld [vmem:[%s3341_s5 + $0x74] ss:$8 sps:$4 sm:$0xff]   ;;  %v2596_v50 = vld [vmem:[%s3341_s5 + $0x70] ss:$8 sps:$4 sm:$0xff]   ;;  %v2602_v51 = vld [vmem:[%s3341_s5 + $0x84] ss:$8 sps:$4 sm:$0xff]  }
  0x12   :  { %v2600_v52 = vld [vmem:[%s3341_s5 + $0x80] ss:$8 sps:$4 sm:$0xff]   ;;  %v2606_v53 = vld [vmem:[%s3341_s5 + $0x94] ss:$8 sps:$4 sm:$0xff]  }
  0x13   :  { %168 = vmatpush1.bf16.msra.mxu0 %v2558_v15 }
  0x14   :  { %2345 = vmatpush3.bf16.msra.mxu1 %v2557_v14  ;;  %169 = vmatprep.subr.bf16.mxu0 %v2559_v16 }
  0x15   :  { %2346 = vmatprep.subr.bf16.mxu1 %v2561_v17 }
  0x17   :  { %170 = vmatpush1.bf16.msra.mxu0 %v2562_v18 }
  0x18   :  { %2347 = vmatpush3.bf16.msra.mxu1 %v2561_v17  ;;  %171 = vmatprep.subr.bf16.mxu0 %v2563_v20 }
  0x19   :  { %2348 = vmatprep.subr.bf16.mxu1 %v2565_v21 }
  0x1b   :  { %172 = vmatpush1.bf16.msra.mxu0 %v2566_v22 }
  0x1c   :  { %2349 = vmatpush3.bf16.msra.mxu1 %v2565_v21  ;;  %173 = vmatprep.subr.bf16.mxu0 %v2567_v23 }
  0x1d   :  { %2350 = vmatprep.subr.bf16.mxu1 %v2569_v24 }
  0x1f   :  { %174 = vmatpush1.bf16.msra.mxu0 %v2570_v25 }
  0x20   :  { %2351 = vmatpush3.bf16.msra.mxu1 %v2569_v24  ;;  %2356 = vmatprep.subr.bf16.mxu0 %v2599_v31 }
  0x21   :  { %682 = vmatprep.subr.bf16.mxu1 %v2577_v26 }
  0x22   :  { %192 = vmatmul.mubr.bf16.vlgmr.msra.gmra.mrb[0].mxu0 %v2572_v27 }
  0x23   :  { %2353 = vmatmul.mubr.bf16.vlgmr.msra.gmra.mrb[0].mxu1 %v2573_v28  ;;  %201 = vmatprep.mubr.bf16.mxu0 %v2744_v2 }
  0x24   :  { %683 = vmatpush1.bf16.msra.mxu1 %v2575_v29  ;;  %2357 = vmatpush3.bf16.msra.mxu0 %v2599_v31 }
  0x25   :  { %684 = vmatprep.subr.bf16.mxu1 %v2580_v30  ;;  %2358 = vmatprep.subr.bf16.mxu0 %v2603_v33 }
  0x28   :  { %685 = vmatpush1.bf16.msra.mxu1 %v2578_v32  ;;  %2359 = vmatpush3.bf16.msra.mxu0 %v2603_v33 }
  0x29   :  { %686 = vmatprep.subr.bf16.mxu1 %v2583_v34  ;;  %2360 = vmatprep.subr.bf16.mxu0 %v2607_v36 }
  0x2a   :  { %202 = vmatmul.mubr.bf16.gmra.mrb[4].mxu0 %v2574_v35 }
  0x2c   :  { %687 = vmatpush1.bf16.msra.mxu1 %v2581_v37  ;;  %2361 = vmatpush3.bf16.msra.mxu0 %v2607_v36 }
  0x2d   :  { %688 = vmatprep.subr.bf16.mxu1 %v2586_v38  ;;  %2362 = vmatprep.subr.bf16.mxu0 %v2611_v39 }
  0x30   :  { %689 = vmatpush1.bf16.msra.mxu1 %v2584_v40  ;;  %2363 = vmatpush3.bf16.msra.mxu0 %v2611_v39 }
  0x31   :  { %690 = vmatprep.subr.bf16.mxu1 %v2589_v41  ;;  %2364 = vmatprep.subr.bf16.mxu0 %v2615_v44 }
  0x34   :  { %691 = vmatpush1.bf16.msra.mxu1 %v2587_v42  ;;  %2365 = vmatpush3.bf16.msra.mxu0 %v2615_v44 }
  0x35   :  { %692 = vmatprep.subr.bf16.mxu1 %v2592_v43  ;;  %2366 = vmatprep.subr.bf16.mxu0 %v2619_v45 }
  0x38   :  { %693 = vmatpush1.bf16.msra.mxu1 %v2590_v46  ;;  %2367 = vmatpush3.bf16.msra.mxu0 %v2619_v45 }
  0x39   :  { %694 = vmatprep.subr.bf16.mxu1 %v2595_v47 }
  0x3c   :  { %695 = vmatpush1.bf16.msra.mxu1 %v2593_v48 }
  0x3d   :  { %696 = vmatprep.subr.bf16.mxu1 %v2598_v49 }
  0x40   :  { %697 = vmatpush1.bf16.msra.mxu1 %v2596_v50 }
  0x41   :  { %698 = vmatprep.subr.bf16.mxu1 %v2602_v51 }
  0x42   :  { %15 = vsyncpa [#allocation3], 0  ;;  %v2604_v54 = vld [vmem:[%s3341_s5 + $0x90] ss:$8 sps:$4 sm:$0xff]   ;;  %v2610_v55 = vld [vmem:[%s3341_s5 + $0xa4] ss:$8 sps:$4 sm:$0xff]   ;;  %v59_v5 = vlaneseq }
  0x43   :  { %v2608_v56 = vld [vmem:[%s3341_s5 + $0xa0] ss:$8 sps:$4 sm:$0xff]   ;;  %v2614_v57 = vld [vmem:[%s3341_s5 + $0xb4] ss:$8 sps:$4 sm:$0xff]   ;;  %v2612_v58 = vld [vmem:[%s3341_s5 + $0xb0] ss:$8 sps:$4 sm:$0xff]  }
  0x44   :  { %699 = vmatpush1.bf16.msra.mxu1 %v2600_v52  ;;  %v2618_v59 = vld [vmem:[%s3341_s5 + $0xc4] ss:$8 sps:$4 sm:$0xff]   ;;  %v2616_v60 = vld [vmem:[%s3341_s5 + $0xc0] ss:$8 sps:$4 sm:$0xff]   ;;  %v2622_v61 = vld [vmem:[%s3341_s5 + $0xd4] ss:$8 sps:$4 sm:$0xff]  }
  0x45   :  { %700 = vmatprep.subr.bf16.mxu1 %v2606_v53  ;;  %v2620_v62 = vld [vmem:[%s3341_s5 + $0xd0] ss:$8 sps:$4 sm:$0xff]   ;;  %v2626_v0 = vld [vmem:[%s3341_s5 + $0xe4] ss:$8 sps:$4 sm:$0xff]   ;;  %v2624_v1 = vld [vmem:[%s3341_s5 + $0xe0] ss:$8 sps:$4 sm:$0xff]  }
  0x46   :  { %v2623_v63 = vld [vmem:[%s3340_s4 + $0x30] sm:$0xff]   ;;  %v2627_v2 = vld [vmem:[%s3340_s4 + $0x38] sm:$0xff]   ;;  %v3012_v6 = vshrl.u32 %v59_v5, 7  ;;  %v37_v9 = vld [vmem:[%s3345_s9] sm:$0xff]  ;;  %vm2746_vm0 = vmmov 0   ;;  %vm739_vm1 = vcmask 261120  }
  0x47   :  { %2368 = vmatprep.subr.bf16.mxu0 %v2623_v63  ;;  %v2630_v3 = vld [vmem:[%s3341_s5 + $0xf4] ss:$8 sps:$4 sm:$0xff]   ;;  %v2628_v4 = vld [vmem:[%s3341_s5 + $0xf0] ss:$8 sps:$4 sm:$0xff]   ;;  %v3022_v10 = vld [vmem:[%s3345_s9 + $0x8] sm:$0xff]  ;;  %vm834_vm2 = vcmask 130048  }
  0x48   :  { %701 = vmatpush1.bf16.msra.mxu1 %v2604_v54  ;;  %2369 = vmatpush3.bf16.msra.mxu0 %v2623_v63  ;;  %v61_v7 = vsub.s32 0, %v3012_v6  ;;  %v246_v8 = vsub.s32 2, %v3012_v6  ;;  %s2747_s5 = smov 96   ;;  %vm1777_vm3 = vcmask 1041409   ;;  %s2748_s17 = smov 64   ;;  %vm1802_vm4 = vcmask 523264  }
  0x49   :  { %702 = vmatprep.subr.bf16.mxu1 %v2610_v55  ;;  %2370 = vmatprep.subr.bf16.mxu0 %v2627_v2  ;;  %s2749_s18 = smov 32   ;;  %vm1804_vm5 = vcmask 785408  }
  0x4a   :  { %v62_v11 = vrot.slane %v37_v9, %v61_v7  ;;  %v247_v12 = vrot.slane %v37_v9, %v246_v8  ;;  %v66_v13 = vrot.slane %v3022_v10, %v61_v7 }
  0x4c   :  { %703 = vmatpush1.bf16.msra.mxu1 %v2608_v56  ;;  %2371 = vmatpush3.bf16.msra.mxu0 %v2627_v2  ;;  %v2745_v56 = vmov 0.0  }
  0x4d   :  { %704 = vmatprep.subr.bf16.mxu1 %v2614_v57  ;;  %2376 = vmatprep.subr.bf16.mxu0 %v2745_v56  ;;  %v381_v57 = vsub.s32 3, %v3012_v6 }
  0x50   :  { %705 = vmatpush1.bf16.msra.mxu1 %v2612_v58  ;;  %v516_v58 = vsub.s32 1, %v3012_v6 }
  0x51   :  { %706 = vmatprep.subr.bf16.mxu1 %v2618_v59  ;;  %v382_v59 = vrot.slane %v37_v9, %v381_v57 }
  0x52   :  { %v521_v63 = vrot.slane %v3022_v10, %v516_v58 }
  0x54   :  { %707 = vmatpush1.bf16.msra.mxu1 %v2616_v60  ;;  %v517_v60 = vrot.slane %v37_v9, %v516_v58 }
  0x55   :  { %708 = vmatprep.subr.bf16.mxu1 %v2622_v61 }
  0x58   :  { %709 = vmatpush1.bf16.msra.mxu1 %v2620_v62 }
  0x59   :  { %710 = vmatprep.subr.bf16.mxu1 %v2626_v0 }
  0x5c   :  { %711 = vmatpush1.bf16.msra.mxu1 %v2624_v1 }
  0x5d   :  { %712 = vmatprep.subr.bf16.mxu1 %v2630_v3 }
  0x60   :  { %713 = vmatpush1.bf16.msra.mxu1 %v2628_v4 }
  0x61   :  { %2424 = vmatprep.subr.bf16.mxu1 %v2745_v56 }
  0xf5   :  { %v193_v14 = vpop.f32.mrb[0].mxu0 }
  0xf6   :  { %v2354_v15 = vpop.f32.mrb[0].mxu1  ;;  %v194_v16 = vadd.f32 %v193_v14, %v62_v11  ;;  %v195_v18 = vpop.f32.mrb[1].mxu0 }
  0xf7   :  { %v351_v17 = vadd.f32 %v2354_v15, %v247_v12  ;;  %v342_v19 = vpop.f32.mrb[1].mxu1  ;;  %v196_v20 = vadd.f32 %v195_v18, %v66_v13  ;;  %v197_v22 = vpop.f32.mrb[2].mxu0 }
  0xf8   :  { %v343_v21 = vadd.f32 %v342_v19, %v247_v12  ;;  %v2355_v23 = vpop.f32.mrb[2].mxu1  ;;  %v198_v25 = vadd.f32 %v197_v22, %v62_v11  ;;  %v199_v27 = vpop.f32.mrb[3].mxu0  ;;  %v212_v32 = vmax.f32 %v194_v16, 0.0 }
  0xf9   :  { %v359_v24 = vmax.f32 %v351_v17, 0.0  ;;  %v354_v26 = vadd.f32 %v2355_v23, %v247_v12  ;;  %v345_v28 = vpop.f32.mrb[3].mxu1  ;;  %v200_v30 = vadd.f32 %v199_v27, %v66_v13  ;;  %v213_v35 = vmax.f32 %v196_v20, 0.0 }
  0xfa   :  { %v357_v29 = vmax.f32 %v343_v21, 0.0  ;;  %v346_v31 = vadd.f32 %v345_v28, %v247_v12  ;;  %v214_v33 = vmax.f32 %v198_v25, 0.0 }
  0xfb   :  { %v360_v34 = vmax.f32 %v354_v26, 0.0  ;;  %v215_v36 = vmax.f32 %v200_v30, 0.0 }
  0xfc   :  { %v358_v37 = vmax.f32 %v346_v31, 0.0  ;;  %v220_v38 = vpack.c.bf16 %v214_v33, %v212_v32 }
  0xfd   :  { %v362_v39 = vpack.c.bf16 %v360_v34, %v359_v24  ;;  %v221_v40 = vpack.c.bf16 %v215_v36, %v213_v35  ;;  %v203_v42 = vpop.f32.mrb[4].mxu0 }
  0xfe   :  { %v361_v41 = vpack.c.bf16 %v358_v37, %v357_v29  ;;  %v204_v43 = vadd.f32 %v203_v42, %v62_v11  ;;  %v205_v44 = vpop.f32.mrb[5].mxu0 }
  0xff   :  { %v206_v45 = vadd.f32 %v205_v44, %v66_v13  ;;  %v207_v46 = vpop.f32.mrb[6].mxu0  ;;  %714 = vmatprep.mubr.bf16.mxu1 %v221_v40 }
 0x100   :  { %2372 = vmatprep.mubr.bf16.mxu0 %v361_v41  ;;  %v208_v47 = vadd.f32 %v207_v46, %v62_v11  ;;  %v209_v48 = vpop.f32.mrb[7].mxu0  ;;  %715 = vmatmul.mubr.bf16.vlgmr.msra.gmra.mrb[4].mxu1 %v220_v38  ;;  %v216_v50 = vmax.f32 %v204_v43, 0.0 }
 0x101   :  { %2373 = vmatmul.mubr.bf16.vlgmr.msra.gmra.mrb[8].mxu0 %v362_v39  ;;  %v210_v49 = vadd.f32 %v209_v48, %v66_v13  ;;  %v217_v52 = vmax.f32 %v206_v45, 0.0 }
 0x102   :  { %v218_v51 = vmax.f32 %v208_v47, 0.0  ;;  %2378 = vmatprep.mubr.msk.bf16.mxu0 %vm2746_vm0, %v2745_v56 }
 0x103   :  { %v219_v53 = vmax.f32 %v210_v49, 0.0 }
 0x104   :  { %v222_v54 = vpack.c.bf16 %v218_v51, %v216_v50 }
 0x105   :  { %v223_v55 = vpack.c.bf16 %v219_v53, %v217_v52 }
 0x107   :  { %724 = vmatprep.mubr.bf16.mxu1 %v223_v55 }
 0x108   :  { %725 = vmatmul.mubr.bf16.gmra.mrb[8].mxu1 %v222_v54 }
 0x109   :  { %2426 = vmatprep.mubr.msk.bf16.mxu1 %vm2746_vm0, %v2745_v56 }
 0x1d3   :  { %v716_v62 = vpop.f32.mrb[4].mxu1 }
 0x1d4   :  { %v2374_v61 = vpop.f32.mrb[8].mxu0  ;;  %v718_v2 = vpop.f32.mrb[5].mxu1  ;;  %v717_v7 = vadd.f32 %v716_v62, %v517_v60 }
 0x1d5   :  { %v474_v0 = vadd.f32 %v2374_v61, %v382_v59  ;;  %v465_v1 = vpop.f32.mrb[9].mxu0  ;;  %v720_v5 = vpop.f32.mrb[6].mxu1  ;;  %v719_v14 = vadd.f32 %v718_v2, %v521_v63 }
 0x1d6   :  { %v466_v3 = vadd.f32 %v465_v1, %v382_v59  ;;  %v2375_v4 = vpop.f32.mrb[10].mxu0  ;;  %v721_v11 = vadd.f32 %v720_v5, %v517_v60  ;;  %v722_v13 = vpop.f32.mrb[7].mxu1 }
 0x1d7   :  { %v477_v8 = vadd.f32 %v2375_v4, %v382_v59  ;;  %v468_v12 = vpop.f32.mrb[11].mxu0  ;;  %v723_v16 = vadd.f32 %v722_v13, %v521_v63 }
 0x1d8   :  { %v469_v15 = vadd.f32 %v468_v12, %v382_v59  ;;  %v3036_v17 = vpack.c.bf16 %v721_v11, %v717_v7 }
 0x1d9   :  { %v3034_v9 = vpack.c.bf16 %v477_v8, %v474_v0  ;;  %v3040_v18 = vpack.c.bf16 %v723_v16, %v719_v14 }
 0x1da   :  { %v3038_v10 = vpack.c.bf16 %v469_v15, %v466_v3  ;;  %v744_v19 = vsel %vm739_vm1, %v3036_v17, 0 }
 0x1db   :  { %v726_v20 = vpop.f32.mrb[8].mxu1  ;;  %2377 = vmatpush3.bf16.xpose.msra.mxu0 %v744_v19 }
 0x1dc   :  { %v728_v21 = vpop.f32.mrb[9].mxu1  ;;  %2382 = vmatprep.subr.bf16.mxu0 %v2745_v56  ;;  %v727_v24 = vadd.f32 %v726_v20, %v517_v60 }
 0x1dd   :  { %v729_v22 = vadd.f32 %v728_v21, %v521_v63  ;;  %v730_v23 = vpop.f32.mrb[10].mxu1 }
 0x1de   :  { %v731_v25 = vadd.f32 %v730_v23, %v517_v60  ;;  %v732_v26 = vpop.f32.mrb[11].mxu1 }
 0x1df   :  { %v733_v27 = vadd.f32 %v732_v26, %v521_v63 }
 0x1e0   :  { %v3045_v28 = vpack.c.bf16 %v731_v25, %v727_v24 }
 0x1e1   :  { %v3047_v29 = vpack.c.bf16 %v733_v27, %v729_v22 }
 0x1e2   :  { %2379 = vmatmul.mubr.msk.bf16.vlgmr.msra.gmra.mrb[12].mxu0 %vm739_vm1, %v3038_v10  ;;  %v791_v30 = vsel %vm739_vm1, %v3045_v28, 0 }
 0x1e3   :  { %2383 = vmatpush3.bf16.xpose.msra.mxu0 %v791_v30  ;;  %2384 = vmatprep.mubr.msk.bf16.mxu0 %vm2746_vm0, %v2745_v56 }
 0x1e4   :  { %2388 = vmatprep.subr.bf16.mxu0 %v2745_v56 }
 0x1ea   :  { %2385 = vmatmul.mubr.msk.bf16.vlgmr.msra.gmra.mrb[16].mxu0 %vm739_vm1, %v3034_v9 }
 0x1eb   :  { %2389 = vmatpush3.bf16.msra.mxu0 %v3040_v18  ;;  %2390 = vmatprep.mubr.msk.bf16.mxu0 %vm2746_vm0, %v2745_v56 }
 0x1ec   :  { %2394 = vmatprep.subr.bf16.mxu0 %v2745_v56 }
 0x2b5   :  { %v780_v31 = vpop.f32.mrb[12].mxu0 }
 0x2b6   :  { %v2380_v32 = vpop.f32.mrb[13].mxu0  ;;  %v835_v33 = vsel %vm834_vm2, %v780_v31, -inf }
 0x2b7   :  { %836 = vmax.xlane.f32.xlu0 %v835_v33  ;;  %v783_v34 = vpop.f32.mrb[14].mxu0 }
 0x2b8   :  { %v2381_v35 = vpop.f32.mrb[15].mxu0  ;;  %v838_v36 = vsel %vm834_vm2, %v783_v34, -inf }
 0x2bb   :  { %839 = vmax.xlane.f32.xlu0 %v838_v36 }
 0x2bd   :  { %v827_v37 = vpop.f32.mrb[16].mxu0 }
 0x2be   :  { %v2386_v38 = vpop.f32.mrb[17].mxu0  ;;  %v841_v39 = vsel %vm834_vm2, %v827_v37, -inf }
 0x2bf   :  { %842 = vmax.xlane.f32.xlu1 %v841_v39  ;;  %v830_v40 = vpop.f32.mrb[18].mxu0 }
 0x2c0   :  { %v2387_v41 = vpop.f32.mrb[19].mxu0  ;;  %v844_v42 = vsel %vm834_vm2, %v830_v40, -inf }
 0x2c3   :  { %845 = vmax.xlane.f32.xlu1 %v844_v42 }
 0x344   :  { %v837_v43 = vpop.xlane.xlu0 %836 }
 0x345   :  { %v847_v44 = vsub.f32 %v780_v31, %v837_v43 }
 0x347   :  { %v851_v45 = vmul.f32 1.442695, %v847_v44 }
 0x348   :  { %v840_v46 = vpop.xlane.xlu0 %839 }
 0x349   :  { %2655 = vpow2.f32 %v851_v45  ;;  %v848_v47 = vsub.f32 %v783_v34, %v840_v46 }
 0x34b   :  { %v853_v48 = vmul.f32 1.442695, %v848_v47 }
 0x34c   :  { %v843_v49 = vpop.xlane.xlu1 %842 }
 0x34d   :  { %2657 = vpow2.f32 %v853_v48  ;;  %v849_v50 = vsub.f32 %v827_v37, %v843_v49 }
 0x34f   :  { %v855_v51 = vmul.f32 1.442695, %v849_v50 }
 0x350   :  { %v846_v52 = vpop.xlane.xlu1 %845 }
 0x351   :  { %2659 = vpow2.f32 %v855_v51  ;;  %v850_v53 = vsub.f32 %v830_v40, %v846_v52 }
 0x353   :  { %v2656_v54 = vpop.eup %2655  ;;  %v857_v55 = vmul.f32 1.442695, %v850_v53 }
 0x354   :  { %v859_v57 = vsel %vm834_vm2, %v2656_v54, 0.0 }
 0x355   :  { %2661 = vpow2.f32 %v857_v55  ;;  %860 = vadd.xlane.f32.xlu0 %v859_v57 }
 0x357   :  { %v2658_v58 = vpop.eup %2657 }
 0x358   :  { %v862_v59 = vsel %vm834_vm2, %v2658_v58, 0.0 }
 0x359   :  { %863 = vadd.xlane.f32.xlu1 %v862_v59 }
 0x35b   :  { %v2660_v60 = vpop.eup %2659 }
 0x35c   :  { %v865_v61 = vsel %vm834_vm2, %v2660_v60, 0.0 }
 0x35d   :  { %866 = vadd.xlane.f32.xlu0 %v865_v61 }
 0x35f   :  { %v2662_v62 = vpop.eup %2661 }
 0x360   :  { %v868_v63 = vsel %vm834_vm2, %v2662_v62, 0.0 }
 0x361   :  { %869 = vadd.xlane.f32.xlu1 %v868_v63 }
 0x372   :  { %989 = vrot.lane.b32.xlu1 %v3038_v10, %s2747_s5 }
 0x373   :  { %992 = vrot.lane.b32.xlu0 %v3036_v17, %s2747_s5 }
 0x376   :  { %1045 = vrot.lane.b32.xlu1 %v3045_v28, %s2747_s5 }
 0x37a   :  { %1042 = vrot.lane.b32.xlu1 %v3034_v9, %s2747_s5 }
 0x3e2   :  { %v861_v0 = vpop.xlane.xlu0 %860 }
 0x3e3   :  { %2663 = vrcp.f32 %v861_v0 }
 0x3e6   :  { %v864_v1 = vpop.xlane.xlu1 %863 }
 0x3e7   :  { %2665 = vrcp.f32 %v864_v1 }
 0x3ea   :  { %v867_v2 = vpop.xlane.xlu0 %866 }
 0x3eb   :  { %2667 = vrcp.f32 %v867_v2 }
 0x3ed   :  { %v2664_v3 = vpop.eup %2663 }
 0x3ee   :  { %v870_v4 = vpop.xlane.xlu1 %869  ;;  %v875_v5 = vmul.f32 %v2664_v3, %v2656_v54  ;;  %v993_v40 = vpop.permute.xlu0 %992 }
 0x3ef   :  { %2669 = vrcp.f32 %v870_v4  ;;  %v998_v43 = vsel %vm739_vm1, %v993_v40, 0 }
 0x3f0   :  { %v879_v11 = vsel %vm834_vm2, %v875_v5, 0.0 }
 0x3f1   :  { %v2666_v7 = vpop.eup %2665 }
 0x3f2   :  { %v876_v8 = vmul.f32 %v2666_v7, %v2658_v58  ;;  %v990_v42 = vpop.permute.xlu1 %989 }
 0x3f4   :  { %v880_v12 = vsel %vm834_vm2, %v876_v8, 0.0 }
 0x3f5   :  { %v2668_v13 = vpop.eup %2667  ;;  %v881_v14 = vadd.f32 %v880_v12, %v879_v11 }
 0x3f6   :  { %v877_v16 = vmul.f32 %v2668_v13, %v2660_v60  ;;  %v1046_v44 = vpop.permute.xlu1 %1045 }
 0x3f7   :  { %v882_v15 = vrot.slane %v881_v14, 4  ;;  %v1051_v45 = vsel %vm739_vm1, %v1046_v44, 0 }
 0x3f8   :  { %v888_v23 = vsel %vm834_vm2, %v877_v16, 0.0 }
 0x3f9   :  { %v2670_v19 = vpop.eup %2669  ;;  %v883_v20 = vadd.f32 %v882_v15, %v881_v14 }
 0x3fa   :  { %v878_v21 = vmul.f32 %v2670_v19, %v2662_v62  ;;  %v1043_v46 = vpop.permute.xlu1 %1042 }
 0x3fb   :  { %v884_v22 = vrot.slane %v883_v20, 2 }
 0x3fc   :  { %v889_v24 = vsel %vm834_vm2, %v878_v21, 0.0 }
 0x3fd   :  { %v890_v25 = vadd.f32 %v889_v24, %v888_v23  ;;  %v885_v26 = vadd.f32 %v884_v22, %v883_v20 }
 0x3ff   :  { %v891_v27 = vrot.slane %v890_v25, 4  ;;  %v886_v30 = vrot.slane %v885_v26, 1 }
 0x401   :  { %v892_v31 = vadd.f32 %v891_v27, %v890_v25  ;;  %v887_v32 = vadd.f32 %v886_v30, %v885_v26 }
 0x403   :  { %v898_v33 = vmul.f32 0.0625, %v887_v32  ;;  %v893_v34 = vrot.slane %v892_v31, 2 }
 0x405   :  { %v900_v35 = vpack.c.bf16 %v898_v33, %v898_v33  ;;  %v894_v36 = vadd.f32 %v893_v34, %v892_v31 }
 0x407   :  { %2391 = vmatmul.mubr.msk.bf16.vlgmr.msra.gmra.mrb[20].mxu0 %vm834_vm2, %v900_v35  ;;  %v895_v37 = vrot.slane %v894_v36, 1 }
 0x408   :  { %2395 = vmatpush3.bf16.msra.mxu0 %v3047_v29  ;;  %2396 = vmatprep.mubr.msk.bf16.mxu0 %vm2746_vm0, %v2745_v56 }
 0x409   :  { %v896_v38 = vadd.f32 %v895_v37, %v894_v36  ;;  %2400 = vmatprep.subr.bf16.mxu0 %v2745_v56 }
 0x40b   :  { %v899_v39 = vmul.f32 0.0625, %v896_v38 }
 0x40d   :  { %v901_v41 = vpack.c.bf16 %v899_v39, %v899_v39 }
 0x40f   :  { %2397 = vmatmul.mubr.msk.bf16.vlgmr.msra.gmra.mrb[24].mxu0 %vm834_vm2, %v901_v41 }
 0x410   :  { %2402 = vmatprep.mubr.msk.bf16.mxu0 %vm2746_vm0, %v2745_v56 }
 0x411   :  { %2401 = vmatpush3.bf16.xpose.msra.mxu0 %v998_v43 }
 0x412   :  { %2406 = vmatprep.subr.bf16.mxu0 %v2745_v56 }
 0x418   :  { %2403 = vmatmul.mubr.msk.bf16.vlgmr.msra.gmra.mrb[28].mxu0 %vm739_vm1, %v990_v42 }
 0x419   :  { %2407 = vmatpush3.bf16.xpose.msra.mxu0 %v1051_v45  ;;  %2408 = vmatprep.mubr.msk.bf16.mxu0 %vm2746_vm0, %v2745_v56 }
 0x41a   :  { %2412 = vmatprep.subr.bf16.mxu0 %v2745_v56 }
 0x420   :  { %2409 = vmatmul.mubr.msk.bf16.vlgmr.msra.gmra.mrb[32].mxu0 %vm739_vm1, %v1043_v46 }
 0x421   :  { %2414 = vmatprep.mubr.msk.bf16.mxu0 %vm2746_vm0, %v2745_v56 }
 0x4da   :  { %v939_v47 = vpop.f32.mrb[20].mxu0 }
 0x4db   :  { %v2392_v48 = vpop.f32.mrb[21].mxu0 }
 0x4dc   :  { %v942_v49 = vpop.f32.mrb[22].mxu0 }
 0x4dd   :  { %v2393_v50 = vpop.f32.mrb[23].mxu0 }
 0x4e2   :  { %v982_v51 = vpop.f32.mrb[24].mxu0 }
 0x4e3   :  { %v1776_v52 = vrot.slane %v982_v51, 7  ;;  %v2398_v53 = vpop.f32.mrb[25].mxu0 }
 0x4e4   :  { %v985_v54 = vpop.f32.mrb[26].mxu0 }
 0x4e5   :  { %v2399_v55 = vpop.f32.mrb[27].mxu0  ;;  %v3101_v57 = vsel %vm1777_vm3, %v1776_v52, %v939_v47 }
 0x4eb   :  { %v1034_v58 = vpop.f32.mrb[28].mxu0 }
 0x4ec   :  { %v2404_v59 = vpop.f32.mrb[29].mxu0  ;;  %v1094_v60 = vsel %vm834_vm2, %v1034_v58, -inf }
 0x4ed   :  { %1095 = vmax.xlane.f32.xlu0 %v1094_v60  ;;  %v1037_v61 = vpop.f32.mrb[30].mxu0 }
 0x4ee   :  { %v2405_v62 = vpop.f32.mrb[31].mxu0  ;;  %v1097_v63 = vsel %vm834_vm2, %v1037_v61, -inf }
 0x4ef   :  { %1098 = vmax.xlane.f32.xlu1 %v1097_v63 }
 0x4f3   :  { %v1087_v0 = vpop.f32.mrb[32].mxu0 }
 0x4f4   :  { %v2410_v1 = vpop.f32.mrb[33].mxu0  ;;  %v1100_v2 = vsel %vm834_vm2, %v1087_v0, -inf }
 0x4f5   :  { %1101 = vmax.xlane.f32.xlu0 %v1100_v2  ;;  %v1090_v3 = vpop.f32.mrb[34].mxu0 }
 0x4f6   :  { %v2411_v4 = vpop.f32.mrb[35].mxu0  ;;  %v1103_v5 = vsel %vm834_vm2, %v1090_v3, -inf }
 0x4f9   :  { %1104 = vmax.xlane.f32.xlu0 %v1103_v5 }
 0x57a   :  { %v1096_v7 = vpop.xlane.xlu0 %1095 }
 0x57b   :  { %v1106_v8 = vsub.f32 %v1034_v58, %v1096_v7 }
 0x57c   :  { %v1099_v11 = vpop.xlane.xlu1 %1098 }
 0x57d   :  { %v1110_v12 = vmul.f32 1.442695, %v1106_v8  ;;  %v1107_v13 = vsub.f32 %v1037_v61, %v1099_v11 }
 0x57f   :  { %2671 = vpow2.f32 %v1110_v12  ;;  %v1112_v14 = vmul.f32 1.442695, %v1107_v13 }
 0x581   :  { %2673 = vpow2.f32 %v1112_v14 }
 0x582   :  { %v1102_v15 = vpop.xlane.xlu0 %1101 }
 0x583   :  { %v1108_v16 = vsub.f32 %v1087_v0, %v1102_v15 }
 0x585   :  { %v1114_v19 = vmul.f32 1.442695, %v1108_v16 }
 0x586   :  { %v1105_v20 = vpop.xlane.xlu0 %1104 }
 0x587   :  { %2675 = vpow2.f32 %v1114_v19  ;;  %v1109_v21 = vsub.f32 %v1090_v3, %v1105_v20 }
 0x589   :  { %v2672_v22 = vpop.eup %2671  ;;  %v1116_v23 = vmul.f32 1.442695, %v1109_v21 }
 0x58a   :  { %v1118_v24 = vsel %vm834_vm2, %v2672_v22, 0.0 }
 0x58b   :  { %v2674_v25 = vpop.eup %2673  ;;  %2677 = vpow2.f32 %v1116_v23  ;;  %1119 = vadd.xlane.f32.xlu0 %v1118_v24 }
 0x58c   :  { %v1121_v26 = vsel %vm834_vm2, %v2674_v25, 0.0 }
 0x58d   :  { %1122 = vadd.xlane.f32.xlu1 %v1121_v26 }
 0x591   :  { %v2676_v27 = vpop.eup %2675 }
 0x592   :  { %v1124_v30 = vsel %vm834_vm2, %v2676_v27, 0.0 }
 0x593   :  { %1125 = vadd.xlane.f32.xlu0 %v1124_v30 }
 0x595   :  { %v2678_v31 = vpop.eup %2677 }
 0x596   :  { %v1127_v32 = vsel %vm834_vm2, %v2678_v31, 0.0 }
 0x597   :  { %1128 = vadd.xlane.f32.xlu1 %v1127_v32 }
 0x5a8   :  { %1208 = vrot.lane.b32.xlu1 %v3047_v29, %s2747_s5 }
 0x5a9   :  { %1161 = vrot.lane.b32.xlu0 %v3040_v18, %s2747_s5 }
 0x5ac   :  { %1307 = vrot.lane.b32.xlu1 %v3045_v28, %s2748_s17 }
 0x5ad   :  { %1305 = vrot.lane.b32.xlu0 %v3034_v9, %s2748_s17 }
 0x5b0   :  { %1256 = vrot.lane.b32.xlu1 %v3036_v17, %s2748_s17 }
 0x5b4   :  { %1254 = vrot.lane.b32.xlu1 %v3038_v10, %s2748_s17 }
 0x618   :  { %v1120_v33 = vpop.xlane.xlu0 %1119 }
 0x619   :  { %2679 = vrcp.f32 %v1120_v33 }
 0x61a   :  { %v1123_v34 = vpop.xlane.xlu1 %1122 }
 0x61b   :  { %2681 = vrcp.f32 %v1123_v34 }
 0x620   :  { %v1126_v35 = vpop.xlane.xlu0 %1125 }
 0x621   :  { %2683 = vrcp.f32 %v1126_v35 }
 0x623   :  { %v2680_v36 = vpop.eup %2679 }
 0x624   :  { %v1134_v37 = vmul.f32 %v2680_v36, %v2672_v22  ;;  %v1129_v38 = vpop.xlane.xlu1 %1128  ;;  %v1162_v39 = vpop.permute.xlu0 %1161 }
 0x625   :  { %v2682_v40 = vpop.eup %2681  ;;  %2685 = vrcp.f32 %v1129_v38  ;;  %2413 = vmatpush3.bf16.msra.mxu0 %v1162_v39 }
 0x626   :  { %v1135_v41 = vmul.f32 %v2682_v40, %v2674_v25  ;;  %2418 = vmatprep.subr.bf16.mxu0 %v2745_v56  ;;  %v1138_v42 = vsel %vm834_vm2, %v1134_v37, 0.0 }
 0x628   :  { %v1139_v43 = vsel %vm834_vm2, %v1135_v41, 0.0  ;;  %v1209_v44 = vpop.permute.xlu1 %1208  ;;  %v1306_v15 = vpop.permute.xlu0 %1305 }
 0x629   :  { %v1140_v45 = vadd.f32 %v1139_v43, %v1138_v42 }
 0x62b   :  { %v2684_v46 = vpop.eup %2683  ;;  %v1141_v47 = vrot.slane %v1140_v45, 4 }
 0x62c   :  { %v1308_v48 = vpop.permute.xlu1 %1307  ;;  %v1136_v50 = vmul.f32 %v2684_v46, %v2676_v27 }
 0x62d   :  { %v1142_v49 = vadd.f32 %v1141_v47, %v1140_v45  ;;  %v1313_v14 = vsel %vm739_vm1, %v1308_v48, 0 }
 0x62e   :  { %v1147_v59 = vsel %vm834_vm2, %v1136_v50, 0.0 }
 0x62f   :  { %v2686_v51 = vpop.eup %2685  ;;  %v1143_v52 = vrot.slane %v1142_v49, 2 }
 0x630   :  { %v1137_v53 = vmul.f32 %v2686_v51, %v2678_v31  ;;  %v1257_v54 = vpop.permute.xlu1 %1256 }
 0x631   :  { %v1262_v55 = vsel %vm739_vm1, %v1257_v54, 0  ;;  %v1144_v58 = vadd.f32 %v1143_v52, %v1142_v49 }
 0x632   :  { %v1148_v60 = vsel %vm834_vm2, %v1137_v53, 0.0  ;;  %2425 = vmatpush3.bf16.xpose.msra.mxu1 %v1262_v55 }
 0x633   :  { %v1149_v61 = vadd.f32 %v1148_v60, %v1147_v59  ;;  %v1145_v62 = vrot.slane %v1144_v58, 1  ;;  %2436 = vmatprep.subr.bf16.mxu1 %v2745_v56 }
 0x634   :  { %v1255_v3 = vpop.permute.xlu1 %1254 }
 0x635   :  { %v1150_v63 = vrot.slane %v1149_v61, 4  ;;  %v1146_v0 = vadd.f32 %v1145_v62, %v1144_v58 }
 0x637   :  { %v1151_v1 = vadd.f32 %v1150_v63, %v1149_v61  ;;  %v1156_v2 = vmul.f32 0.0625, %v1146_v0 }
 0x639   :  { %2427 = vmatmul.mubr.msk.bf16.vlgmr.msra.gmra.mrb[12].mxu1 %vm739_vm1, %v1255_v3  ;;  %v1158_v4 = vpack.c.bf16 %v1156_v2, %v1156_v2  ;;  %v1152_v5 = vrot.slane %v1151_v1, 2 }
 0x63a   :  { %2438 = vmatprep.mubr.msk.bf16.mxu1 %vm2746_vm0, %v2745_v56 }
 0x63b   :  { %2415 = vmatmul.mubr.msk.bf16.vlgmr.msra.gmra.mrb[36].mxu0 %vm834_vm2, %v1158_v4  ;;  %v1153_v7 = vadd.f32 %v1152_v5, %v1151_v1 }
 0x63c   :  { %2419 = vmatpush3.bf16.msra.mxu0 %v1209_v44  ;;  %2420 = vmatprep.mubr.msk.bf16.mxu0 %vm2746_vm0, %v2745_v56 }
 0x63d   :  { %2430 = vmatprep.subr.bf16.mxu0 %v2745_v56  ;;  %v1154_v8 = vrot.slane %v1153_v7, 1 }
 0x63f   :  { %v1155_v11 = vadd.f32 %v1154_v8, %v1153_v7 }
 0x641   :  { %v1157_v12 = vmul.f32 0.0625, %v1155_v11 }
 0x643   :  { %v1159_v13 = vpack.c.bf16 %v1157_v12, %v1157_v12 }
 0x645   :  { %2421 = vmatmul.mubr.msk.bf16.vlgmr.msra.gmra.mrb[40].mxu0 %vm834_vm2, %v1159_v13 }
 0x646   :  { %2431 = vmatpush3.bf16.xpose.msra.mxu0 %v1313_v14  ;;  %2432 = vmatprep.mubr.msk.bf16.mxu0 %vm2746_vm0, %v2745_v56 }
 0x647   :  { %2442 = vmatprep.subr.bf16.mxu0 %v2745_v56 }
 0x64d   :  { %2433 = vmatmul.mubr.msk.bf16.vlgmr.msra.gmra.mrb[44].mxu0 %vm739_vm1, %v1306_v15 }
 0x64e   :  { %2444 = vmatprep.mubr.msk.bf16.mxu0 %vm2746_vm0, %v2745_v56 }
 0x70c   :  { %v1298_v16 = vpop.f32.mrb[12].mxu1 }
 0x70d   :  { %v2428_v19 = vpop.f32.mrb[13].mxu1  ;;  %v1356_v40 = vsel %vm834_vm2, %v1298_v16, -inf }
 0x70e   :  { %v1201_v20 = vpop.f32.mrb[36].mxu0  ;;  %v1301_v21 = vpop.f32.mrb[14].mxu1 }
 0x70f   :  { %v2416_v22 = vpop.f32.mrb[37].mxu0  ;;  %v2429_v23 = vpop.f32.mrb[15].mxu1  ;;  %v1359_v41 = vsel %vm834_vm2, %v1301_v21, -inf }
 0x710   :  { %v1204_v24 = vpop.f32.mrb[38].mxu0 }
 0x711   :  { %v2417_v25 = vpop.f32.mrb[39].mxu0 }
 0x718   :  { %v1248_v26 = vpop.f32.mrb[40].mxu0 }
 0x719   :  { %v1782_v27 = vrot.slane %v1248_v26, 7  ;;  %v2422_v30 = vpop.f32.mrb[41].mxu0 }
 0x71a   :  { %v1251_v31 = vpop.f32.mrb[42].mxu0 }
 0x71b   :  { %v2423_v32 = vpop.f32.mrb[43].mxu0  ;;  %v3146_v33 = vsel %vm1777_vm3, %v1782_v27, %v1201_v20 }
 0x720   :  { %v1349_v34 = vpop.f32.mrb[44].mxu0 }
 0x721   :  { %v2434_v35 = vpop.f32.mrb[45].mxu0  ;;  %v1362_v36 = vsel %vm834_vm2, %v1349_v34, -inf }
 0x722   :  { %1363 = vmax.xlane.f32.xlu0 %v1362_v36  ;;  %v1352_v37 = vpop.f32.mrb[46].mxu0 }
 0x723   :  { %v2435_v38 = vpop.f32.mrb[47].mxu0  ;;  %v1365_v39 = vsel %vm834_vm2, %v1352_v37, -inf }
 0x724   :  { %1366 = vmax.xlane.f32.xlu1 %v1365_v39 }
 0x726   :  { %1357 = vmax.xlane.f32.xlu0 %v1356_v40 }
 0x72a   :  { %1360 = vmax.xlane.f32.xlu0 %v1359_v41 }
 0x7af   :  { %v1364_v42 = vpop.xlane.xlu0 %1363 }
 0x7b0   :  { %v1370_v43 = vsub.f32 %v1349_v34, %v1364_v42 }
 0x7b1   :  { %v1367_v44 = vpop.xlane.xlu1 %1366 }
 0x7b2   :  { %v1376_v45 = vmul.f32 1.442695, %v1370_v43  ;;  %v1371_v46 = vsub.f32 %v1352_v37, %v1367_v44 }
 0x7b3   :  { %v1358_v47 = vpop.xlane.xlu0 %1357 }
 0x7b4   :  { %2687 = vpow2.f32 %v1376_v45  ;;  %v1378_v48 = vmul.f32 1.442695, %v1371_v46  ;;  %v1368_v49 = vsub.f32 %v1298_v16, %v1358_v47 }
 0x7b6   :  { %2689 = vpow2.f32 %v1378_v48  ;;  %v1372_v50 = vmul.f32 1.442695, %v1368_v49 }
 0x7b7   :  { %v1361_v51 = vpop.xlane.xlu0 %1360 }
 0x7b8   :  { %2691 = vpow2.f32 %v1372_v50  ;;  %v1369_v52 = vsub.f32 %v1301_v21, %v1361_v51 }
 0x7ba   :  { %v1374_v53 = vmul.f32 1.442695, %v1369_v52 }
 0x7bc   :  { %2693 = vpow2.f32 %v1374_v53 }
 0x7be   :  { %v2688_v54 = vpop.eup %2687 }
 0x7bf   :  { %v1386_v55 = vsel %vm834_vm2, %v2688_v54, 0.0 }
 0x7c0   :  { %v2690_v58 = vpop.eup %2689  ;;  %1387 = vadd.xlane.f32.xlu0 %v1386_v55 }
 0x7c1   :  { %v1389_v59 = vsel %vm834_vm2, %v2690_v58, 0.0 }
 0x7c2   :  { %v2692_v60 = vpop.eup %2691  ;;  %1390 = vadd.xlane.f32.xlu1 %v1389_v59 }
 0x7c3   :  { %v1380_v61 = vsel %vm834_vm2, %v2692_v60, 0.0 }
 0x7c4   :  { %1381 = vadd.xlane.f32.xlu0 %v1380_v61 }
 0x7c6   :  { %v2694_v62 = vpop.eup %2693 }
 0x7c7   :  { %v1383_v63 = vsel %vm834_vm2, %v2694_v62, 0.0 }
 0x7c8   :  { %1384 = vadd.xlane.f32.xlu1 %v1383_v63 }
 0x7d9   :  { %1422 = vrot.lane.b32.xlu1 %v3040_v18, %s2748_s17 }
 0x7da   :  { %1468 = vrot.lane.b32.xlu0 %v3047_v29, %s2748_s17 }
 0x7dd   :  { %1567 = vrot.lane.b32.xlu1 %v3045_v28, %s2749_s18 }
 0x7de   :  { %1565 = vrot.lane.b32.xlu0 %v3034_v9, %s2749_s18 }
 0x7e1   :  { %1516 = vrot.lane.b32.xlu1 %v3036_v17, %s2749_s18 }
 0x7e5   :  { %1514 = vrot.lane.b32.xlu1 %v3038_v10, %s2749_s18 }
 0x84d   :  { %v1388_v0 = vpop.xlane.xlu0 %1387 }
 0x84e   :  { %2695 = vrcp.f32 %v1388_v0 }
 0x84f   :  { %v1391_v1 = vpop.xlane.xlu1 %1390 }
 0x850   :  { %2697 = vrcp.f32 %v1391_v1 }
 0x851   :  { %v1382_v2 = vpop.xlane.xlu0 %1381 }
 0x852   :  { %2699 = vrcp.f32 %v1382_v2 }
 0x855   :  { %v1469_v3 = vpop.permute.xlu0 %1468  ;;  %v1385_v4 = vpop.xlane.xlu1 %1384 }
 0x856   :  { %2701 = vrcp.f32 %v1385_v4  ;;  %2443 = vmatpush3.bf16.msra.mxu0 %v1469_v3 }
 0x857   :  { %2454 = vmatprep.subr.bf16.mxu0 %v2745_v56 }
 0x858   :  { %v2696_v28 = vpop.eup %2695 }
 0x859   :  { %v1398_v9 = vmul.f32 %v2696_v28, %v2688_v54  ;;  %v1423_v5 = vpop.permute.xlu1 %1422  ;;  %v1566_v44 = vpop.permute.xlu0 %1565 }
 0x85a   :  { %v2698_v7 = vpop.eup %2697  ;;  %2437 = vmatpush3.bf16.msra.mxu1 %v1423_v5 }
 0x85b   :  { %v1399_v17 = vmul.f32 %v2698_v7, %v2690_v58  ;;  %2448 = vmatprep.subr.bf16.mxu1 %v2745_v56  ;;  %v1409_v8 = vsel %vm834_vm2, %v1398_v9, 0.0 }
 0x85c   :  { %v2700_v10 = vpop.eup %2699 }
 0x85d   :  { %v1410_v11 = vsel %vm834_vm2, %v1399_v17, 0.0  ;;  %v1396_v13 = vmul.f32 %v2700_v10, %v2692_v60  ;;  %v1568_v35 = vpop.permute.xlu1 %1567 }
 0x85e   :  { %v1411_v12 = vadd.f32 %v1410_v11, %v1409_v8  ;;  %v1573_v38 = vsel %vm739_vm1, %v1568_v35, 0 }
 0x85f   :  { %v1400_v20 = vsel %vm834_vm2, %v1396_v13, 0.0 }
 0x860   :  { %v2702_v14 = vpop.eup %2701  ;;  %v1412_v15 = vrot.slane %v1411_v12, 4 }
 0x861   :  { %v1397_v16 = vmul.f32 %v2702_v14, %v2694_v62  ;;  %v1517_v41 = vpop.permute.xlu1 %1516 }
 0x862   :  { %v1413_v19 = vadd.f32 %v1412_v15, %v1411_v12  ;;  %v1522_v43 = vsel %vm739_vm1, %v1517_v41, 0 }
 0x863   :  { %v1401_v21 = vsel %vm834_vm2, %v1397_v16, 0.0 }
 0x864   :  { %v1402_v22 = vadd.f32 %v1401_v21, %v1400_v20  ;;  %v1414_v23 = vrot.slane %v1413_v19, 2 }
 0x865   :  { %v1515_v45 = vpop.permute.xlu1 %1514 }
 0x866   :  { %v1403_v24 = vrot.slane %v1402_v22, 4  ;;  %v1415_v25 = vadd.f32 %v1414_v23, %v1413_v19 }
 0x868   :  { %v1404_v26 = vadd.f32 %v1403_v24, %v1402_v22  ;;  %v1416_v27 = vrot.slane %v1415_v25, 1 }
 0x86a   :  { %v1417_v30 = vadd.f32 %v1416_v27, %v1415_v25  ;;  %v1405_v31 = vrot.slane %v1404_v26, 2 }
 0x86c   :  { %v1419_v32 = vmul.f32 0.0625, %v1417_v30  ;;  %v1406_v34 = vadd.f32 %v1405_v31, %v1404_v26 }
 0x86e   :  { %v1421_v36 = vpack.c.bf16 %v1419_v32, %v1419_v32  ;;  %v1407_v37 = vrot.slane %v1406_v34, 1 }
 0x870   :  { %2445 = vmatmul.mubr.msk.bf16.vlgmr.msra.gmra.mrb[48].mxu0 %vm834_vm2, %v1421_v36  ;;  %v1408_v39 = vadd.f32 %v1407_v37, %v1406_v34 }
 0x871   :  { %2455 = vmatpush3.bf16.xpose.msra.mxu0 %v1573_v38  ;;  %2456 = vmatprep.mubr.msk.bf16.mxu0 %vm2746_vm0, %v2745_v56 }
 0x872   :  { %v1418_v40 = vmul.f32 0.0625, %v1408_v39  ;;  %2466 = vmatprep.subr.bf16.mxu0 %v2745_v56 }
 0x874   :  { %v1420_v42 = vpack.c.bf16 %v1418_v40, %v1418_v40 }
 0x876   :  { %2439 = vmatmul.mubr.msk.bf16.vlgmr.msra.gmra.mrb[16].mxu1 %vm834_vm2, %v1420_v42 }
 0x877   :  { %2449 = vmatpush3.bf16.xpose.msra.mxu1 %v1522_v43  ;;  %2450 = vmatprep.mubr.msk.bf16.mxu1 %vm2746_vm0, %v2745_v56 }
 0x878   :  { %2457 = vmatmul.mubr.msk.bf16.vlgmr.msra.gmra.mrb[52].mxu0 %vm739_vm1, %v1566_v44  ;;  %2460 = vmatprep.subr.bf16.mxu1 %v2745_v56 }
 0x879   :  { %2468 = vmatprep.mubr.msk.bf16.mxu0 %vm2746_vm0, %v2745_v56 }
 0x87e   :  { %2451 = vmatmul.mubr.msk.bf16.vlgmr.msra.gmra.mrb[20].mxu1 %vm739_vm1, %v1515_v45 }
 0x87f   :  { %2462 = vmatprep.mubr.msk.bf16.mxu1 %vm2746_vm0, %v2745_v56 }
 0x943   :  { %v1508_v46 = vpop.f32.mrb[48].mxu0 }
 0x944   :  { %v2446_v47 = vpop.f32.mrb[49].mxu0  ;;  %v1789_v50 = vrot.slane %v1508_v46, 7 }
 0x945   :  { %v1511_v48 = vpop.f32.mrb[50].mxu0 }
 0x946   :  { %v2447_v49 = vpop.f32.mrb[51].mxu0 }
 0x949   :  { %v1462_v51 = vpop.f32.mrb[16].mxu1 }
 0x94a   :  { %v2440_v52 = vpop.f32.mrb[17].mxu1  ;;  %v1790_v53 = vsel %vm1777_vm3, %v1789_v50, %v1462_v51 }
 0x94b   :  { %v1465_v54 = vpop.f32.mrb[18].mxu1  ;;  %v1609_v55 = vpop.f32.mrb[52].mxu0 }
 0x94c   :  { %v2441_v58 = vpop.f32.mrb[19].mxu1  ;;  %v2458_v59 = vpop.f32.mrb[53].mxu0  ;;  %v1622_v60 = vsel %vm834_vm2, %v1609_v55, -inf }
 0x94d   :  { %1623 = vmax.xlane.f32.xlu0 %v1622_v60  ;;  %v1612_v61 = vpop.f32.mrb[54].mxu0 }
 0x94e   :  { %v2459_v62 = vpop.f32.mrb[55].mxu0  ;;  %v1625_v63 = vsel %vm834_vm2, %v1612_v61, -inf }
 0x94f   :  { %1626 = vmax.xlane.f32.xlu1 %v1625_v63 }
 0x951   :  { %v1558_v0 = vpop.f32.mrb[20].mxu1 }
 0x952   :  { %v2452_v1 = vpop.f32.mrb[21].mxu1  ;;  %v1616_v2 = vsel %vm834_vm2, %v1558_v0, -inf }
 0x953   :  { %v1561_v3 = vpop.f32.mrb[22].mxu1  ;;  %1617 = vmax.xlane.f32.xlu0 %v1616_v2  ;;  %v2631_v1 = vld [vmem:[%s3342_s6] sm:$0xff]   ;;  %v2632_v2 = vld [vmem:[%s3342_s6 + $0x8] sm:$0xff]  }
 0x954   :  { %v2453_v4 = vpop.f32.mrb[23].mxu1  ;;  %v1619_v28 = vsel %vm834_vm2, %v1561_v3, -inf }
 0x955   :  { %v2634_v4 = vld [vmem:[%s3342_s6 + $0x18] sm:$0xff]  }
 0x957   :  { %1620 = vmax.xlane.f32.xlu0 %v1619_v28  ;;  %v2635_v28 = vld [vmem:[%s3342_s6 + $0x20] sm:$0xff]  }
 0x9da   :  { %v1624_v9 = vpop.xlane.xlu0 %1623 }
 0x9db   :  { %v1630_v5 = vsub.f32 %v1609_v55, %v1624_v9  ;;  %v2636_v9 = vld [vmem:[%s3342_s6 + $0x28] sm:$0xff]  }
 0x9dc   :  { %v1627_v7 = vpop.xlane.xlu1 %1626 }
 0x9dd   :  { %v1636_v17 = vmul.f32 1.442695, %v1630_v5  ;;  %v1631_v10 = vsub.f32 %v1612_v61, %v1627_v7  ;;  %v2637_v5 = vld [vmem:[%s3342_s6 + $0x30] sm:$0xff]   ;;  %v2638_v7 = vld [vmem:[%s3342_s6 + $0x38] sm:$0xff]  }
 0x9df   :  { %2703 = vpow2.f32 %v1636_v17  ;;  %v1638_v8 = vmul.f32 1.442695, %v1631_v10  ;;  %v2639_v10 = vld [vmem:[%s3343_s7] sm:$0xff]  }
 0x9e0   :  { %v1618_v11 = vpop.xlane.xlu0 %1617 }
 0x9e1   :  { %2705 = vpow2.f32 %v1638_v8  ;;  %v1628_v12 = vsub.f32 %v1558_v0, %v1618_v11 }
 0x9e3   :  { %v1632_v13 = vmul.f32 1.442695, %v1628_v12  ;;  %v2640_v12 = vld [vmem:[%s3343_s7 + $0x8] sm:$0xff]  }
 0x9e4   :  { %v1621_v14 = vpop.xlane.xlu0 %1620 }
 0x9e5   :  { %2707 = vpow2.f32 %v1632_v13  ;;  %v1629_v15 = vsub.f32 %v1561_v3, %v1621_v14  ;;  %v2633_v3 = vld [vmem:[%s3342_s6 + $0x10] sm:$0xff]  }
 0x9e6   :  { %v2641_v14 = vld [vmem:[%s3343_s7 + $0x10] sm:$0xff]  }
 0x9e7   :  { %v1634_v16 = vmul.f32 1.442695, %v1629_v15 }
 0x9e9   :  { %v2704_v19 = vpop.eup %2703  ;;  %2709 = vpow2.f32 %v1634_v16 }
 0x9ea   :  { %v1646_v20 = vsel %vm834_vm2, %v2704_v19, 0.0 }
 0x9eb   :  { %v2706_v21 = vpop.eup %2705  ;;  %1647 = vadd.xlane.f32.xlu0 %v1646_v20 }
 0x9ec   :  { %v1649_v22 = vsel %vm834_vm2, %v2706_v21, 0.0 }
 0x9ed   :  { %1650 = vadd.xlane.f32.xlu1 %v1649_v22  ;;  %v2642_v22 = vld [vmem:[%s3343_s7 + $0x18] sm:$0xff]  }
 0x9ef   :  { %v2708_v23 = vpop.eup %2707 }
 0x9f0   :  { %v1640_v24 = vsel %vm834_vm2, %v2708_v23, 0.0 }
 0x9f1   :  { %1641 = vadd.xlane.f32.xlu0 %v1640_v24  ;;  %v2643_v24 = vld [vmem:[%s3343_s7 + $0x20] sm:$0xff]  }
 0x9f3   :  { %v2710_v25 = vpop.eup %2709 }
 0x9f4   :  { %v1643_v26 = vsel %vm834_vm2, %v2710_v25, 0.0 }
 0x9f5   :  { %1644 = vadd.xlane.f32.xlu1 %v1643_v26  ;;  %v2645_v26 = vld [vmem:[%s3343_s7 + $0x30] sm:$0xff]  }
 0xa06   :  { %1682 = vrot.lane.b32.xlu1 %v3040_v18, %s2749_s18 }
 0xa07   :  { %1728 = vrot.lane.b32.xlu0 %v3047_v29, %s2749_s18 }
 0xa0a   :  { %1784 = vrot.lane.b32.xlu1 %v3146_v33, %s2749_s18 }
 0xa0e   :  { %1791 = vrot.lane.b32.xlu1 %v1790_v53, %s2748_s17 }
 0xa78   :  { %v1648_v27 = vpop.xlane.xlu0 %1647 }
 0xa79   :  { %2711 = vrcp.f32 %v1648_v27 }
 0xa7a   :  { %v1651_v30 = vpop.xlane.xlu1 %1650 }
 0xa7b   :  { %2713 = vrcp.f32 %v1651_v30 }
 0xa7e   :  { %v1642_v31 = vpop.xlane.xlu0 %1641 }
 0xa7f   :  { %2715 = vrcp.f32 %v1642_v31 }
 0xa82   :  { %v1729_v32 = vpop.permute.xlu0 %1728  ;;  %v1645_v34 = vpop.xlane.xlu1 %1644 }
 0xa83   :  { %v2712_v35 = vpop.eup %2711  ;;  %2717 = vrcp.f32 %v1645_v34  ;;  %2467 = vmatpush3.bf16.msra.mxu0 %v1729_v32 }
 0xa84   :  { %v1658_v18 = vmul.f32 %v2712_v35, %v2704_v19  ;;  %2492 = vmatprep.subr.bf16.mxu0 %v2745_v56 }
 0xa85   :  { %v2714_v29 = vpop.eup %2713 }
 0xa86   :  { %v1659_v36 = vmul.f32 %v2714_v29, %v2706_v21  ;;  %v1683_v37 = vpop.permute.xlu1 %1682  ;;  %v1669_v33 = vsel %vm834_vm2, %v1658_v18, 0.0  ;;  %v2646_v29 = vld [vmem:[%s3343_s7 + $0x38] sm:$0xff]  }
 0xa87   :  { %2461 = vmatpush3.bf16.msra.mxu1 %v1683_v37  ;;  %v2649_v37 = vld [vmem:[%s3344_s8 + $0x10] sm:$0xff]  }
 0xa88   :  { %v1670_v38 = vsel %vm834_vm2, %v1659_v36, 0.0  ;;  %2472 = vmatprep.subr.bf16.mxu1 %v2745_v56  ;;  %v2647_v36 = vld [vmem:[%s3344_s8] sm:$0xff]  }
 0xa89   :  { %v2716_v39 = vpop.eup %2715  ;;  %v1671_v40 = vadd.f32 %v1670_v38, %v1669_v33  ;;  %v2650_v33 = vld [vmem:[%s3344_s8 + $0x18] sm:$0xff]   ;;  %v2651_v38 = vld [vmem:[%s3344_s8 + $0x20] sm:$0xff]  }
 0xa8a   :  { %v1656_v42 = vmul.f32 %v2716_v39, %v2708_v23  ;;  %v1785_v27 = vpop.permute.xlu1 %1784  ;;  %v2652_v39 = vld [vmem:[%s3344_s8 + $0x28] sm:$0xff]  }
 0xa8b   :  { %v1672_v41 = vrot.slane %v1671_v40, 4  ;;  %v1801_v31 = vsel %vm739_vm1, %v3101_v57, %v1785_v27  ;;  %v2648_v57 = vld [vmem:[%s3344_s8 + $0x8] sm:$0xff]  }
 0xa8c   :  { %v1660_v47 = vsel %vm834_vm2, %v1656_v42, 0.0 }
 0xa8d   :  { %v2718_v43 = vpop.eup %2717  ;;  %v1673_v44 = vadd.f32 %v1672_v41, %v1671_v40  ;;  %v1825_v40 = vsub.s32 4, %v3012_v6  ;;  %v2719_v41 = vld [vmem:[%s3345_s9] sm:$0xff]  ;;  %s2750_s9 = smov [#allocation2]  }
 0xa8e   :  { %v1657_v45 = vmul.f32 %v2718_v43, %v2710_v25  ;;  %v2644_v25 = vld [vmem:[%s3343_s7 + $0x28] sm:$0xff]   ;;  %v1792_v30 = vpop.permute.xlu1 %1791  ;;  %s2141_s15 = sshll.u32 %s2750_s9, 4  ;;  %s2142_s15 = int_to_ptr.vmem [resolvable:$true] %s2141_s15 }
 0xa8f   :  { %v1674_v46 = vrot.slane %v1673_v44, 2  ;;  %v1803_v32 = vsel %vm1802_vm4, %v1801_v31, %v1792_v30  ;;  %v1826_v42 = vrot.slane %v2719_v41, %v1825_v40  ;;  %p2725_p1 = scmp.lt.s32.totalorder %s2142_s15, %s2142_s15 }
 0xa90   :  { %v1661_v48 = vsel %vm834_vm2, %v1657_v45, 0.0 }
 0xa91   :  { %v1662_v49 = vadd.f32 %v1661_v48, %v1660_v47  ;;  %v1675_v50 = vadd.f32 %v1674_v46, %v1673_v44 }
 0xa93   :  { %v1663_v51 = vrot.slane %v1662_v49, 4  ;;  %v1676_v52 = vrot.slane %v1675_v50, 1 }
 0xa95   :  { %v1664_v53 = vadd.f32 %v1663_v51, %v1662_v49  ;;  %v1677_v54 = vadd.f32 %v1676_v52, %v1675_v50  ;;  %v2653_v49 = vld [vmem:[%s3344_s8 + $0x30] sm:$0xff]   ;;  %v2654_v50 = vld [vmem:[%s3344_s8 + $0x38] sm:$0xff]   ;;  %v1934_v51 = vsub.s32 5, %v3012_v6  ;;  %s2720_s8 = scalar_lea.vmem %s2142_s15, 32 }
 0xa96   :  { %p2721_p0 = scmp.ne.s32.totalorder %s2142_s15, %s2720_s8  ;;  %p2726_p2 = scmp.lt.s32.totalorder %s2720_s8, %s2720_s8 }
 0xa97   :  { %v1679_v55 = vmul.f32 0.0625, %v1677_v54  ;;  %v1665_v58 = vrot.slane %v1664_v53, 2  ;;  %v1935_v52 = vrot.slane %v2719_v41, %v1934_v51 }
 0xa98   :  { %p2727_p3 = por %p2726_p2, %p2725_p1 }
 0xa99   :  { %v1681_v59 = vpack.c.bf16 %v1679_v55, %v1679_v55  ;;  %v1666_v60 = vadd.f32 %v1665_v58, %v1664_v53 }
 0xa9a   :  { %p2728_p4 = pnand %p2727_p3, %p2721_p0 }
 0xa9b   :  { %2469 = vmatmul.mubr.msk.bf16.vlgmr.msra.gmra.mrb[56].mxu0 %vm834_vm2, %v1681_v59  ;;  %v1667_v61 = vrot.slane %v1666_v60, 1 }
 0xa9c   :  { %2508 = vmatprep.mubr.msk.bf16.mxu0 %vm2746_vm0, %v2745_v56  ;;  %2493 = vmatpush3.bf16.msra.mxu0 %v2639_v10 }
 0xa9d   :  { %v1668_v62 = vadd.f32 %v1667_v61, %v1666_v60  ;;  %2494 = vmatprep.subr.bf16.mxu0 %v2745_v56 }
 0xa9f   :  { %v1678_v63 = vmul.f32 0.0625, %v1668_v62  ;;  %v2044_v62 = vsub.s32 6, %v3012_v6 }
 0xaa0   :  { %2495 = vmatpush3.bf16.msra.mxu0 %v2640_v12 }
 0xaa1   :  { %v1680_v0 = vpack.c.bf16 %v1678_v63, %v1678_v63  ;;  %2496 = vmatprep.subr.bf16.mxu0 %v2745_v56  ;;  %v2045_v63 = vrot.slane %v2719_v41, %v2044_v62 }
 0xaa3   :  { %2463 = vmatmul.mubr.msk.bf16.vlgmr.msra.gmra.mrb[24].mxu1 %vm834_vm2, %v1680_v0 }
 0xaa4   :  { %2488 = vmatprep.mubr.msk.bf16.mxu1 %vm2746_vm0, %v2745_v56  ;;  %2473 = vmatpush3.bf16.msra.mxu1 %v2631_v1 }
 0xaa5   :  { %2474 = vmatprep.subr.bf16.mxu1 %v2745_v56  ;;  %2497 = vmatpush3.bf16.msra.mxu0 %v2641_v14 }
 0xaa6   :  { %2498 = vmatprep.subr.bf16.mxu0 %v2745_v56 }
 0xaa8   :  { %2475 = vmatpush3.bf16.msra.mxu1 %v2632_v2 }
 0xaa9   :  { %2476 = vmatprep.subr.bf16.mxu1 %v2745_v56  ;;  %2499 = vmatpush3.bf16.msra.mxu0 %v2642_v22 }
 0xaaa   :  { %2500 = vmatprep.subr.bf16.mxu0 %v2745_v56 }
 0xaac   :  { %2477 = vmatpush3.bf16.msra.mxu1 %v2633_v3 }
 0xaad   :  { %2478 = vmatprep.subr.bf16.mxu1 %v2745_v56  ;;  %2501 = vmatpush3.bf16.msra.mxu0 %v2643_v24 }
 0xaae   :  { %2502 = vmatprep.subr.bf16.mxu0 %v2745_v56 }
 0xab0   :  { %2479 = vmatpush3.bf16.msra.mxu1 %v2634_v4 }
 0xab1   :  { %2480 = vmatprep.subr.bf16.mxu1 %v2745_v56  ;;  %2503 = vmatpush3.bf16.msra.mxu0 %v2644_v25 }
 0xab2   :  { %2504 = vmatprep.subr.bf16.mxu0 %v2745_v56 }
 0xab4   :  { %2481 = vmatpush3.bf16.msra.mxu1 %v2635_v28 }
 0xab5   :  { %2482 = vmatprep.subr.bf16.mxu1 %v2745_v56  ;;  %2505 = vmatpush3.bf16.msra.mxu0 %v2645_v26 }
 0xab6   :  { %2506 = vmatprep.subr.bf16.mxu0 %v2745_v56 }
 0xab8   :  { %2483 = vmatpush3.bf16.msra.mxu1 %v2636_v9 }
 0xab9   :  { %2484 = vmatprep.subr.bf16.mxu1 %v2745_v56  ;;  %2507 = vmatpush3.bf16.msra.mxu0 %v2646_v29 }
 0xabc   :  { %2485 = vmatpush3.bf16.msra.mxu1 %v2637_v5 }
 0xabd   :  { %2486 = vmatprep.subr.bf16.mxu1 %v2745_v56 }
 0xac0   :  { %2487 = vmatpush3.bf16.msra.mxu1 %v2638_v7 }
 0xac1   :  { %2512 = vmatprep.subr.bf16.mxu1 %v2745_v56 }
 0xb6e   :  { %v1768_v17 = vpop.f32.mrb[56].mxu0 }
 0xb6f   :  { %v2470_v8 = vpop.f32.mrb[57].mxu0  ;;  %v1796_v15 = vrot.slane %v1768_v17, 7 }
 0xb70   :  { %v1771_v11 = vpop.f32.mrb[58].mxu0 }
 0xb71   :  { %v2471_v13 = vpop.f32.mrb[59].mxu0 }
 0xb76   :  { %v1722_v16 = vpop.f32.mrb[24].mxu1 }
 0xb77   :  { %v2464_v19 = vpop.f32.mrb[25].mxu1  ;;  %v1797_v20 = vsel %vm1777_vm3, %v1796_v15, %v1722_v16 }
 0xb78   :  { %v1725_v21 = vpop.f32.mrb[26].mxu1  ;;  %1798 = vrot.lane.b32.xlu0 %v1797_v20, %s2747_s5 }
 0xb79   :  { %v2465_v23 = vpop.f32.mrb[27].mxu1 }
 0xbea   :  { %v1799_v34 = vpop.permute.xlu0 %1798 }
 0xbeb   :  { %v1805_v35 = vsel %vm1804_vm5, %v1803_v32, %v1799_v34 }
 0xbec   :  { %v1806_v18 = vpack.c.bf16 %v1805_v35, %v1805_v35 }
 0xbee   :  { %2489 = vmatmul.mubr.bf16.vlgmr.msra.gmra.mrb[28].mxu1 %v1806_v18 }
 0xbef   :  { %2528 = vmatprep.mubr.msk.bf16.mxu1 %vm2746_vm0, %v2745_v56  ;;  %2513 = vmatpush3.bf16.msra.mxu1 %v2647_v36 }
 0xbf0   :  { %2514 = vmatprep.subr.bf16.mxu1 %v2745_v56 }
 0xbf3   :  { %2515 = vmatpush3.bf16.msra.mxu1 %v2648_v57 }
 0xbf4   :  { %2516 = vmatprep.subr.bf16.mxu1 %v2745_v56 }
 0xbf7   :  { %2517 = vmatpush3.bf16.msra.mxu1 %v2649_v37 }
 0xbf8   :  { %2518 = vmatprep.subr.bf16.mxu1 %v2745_v56 }
 0xbfb   :  { %2519 = vmatpush3.bf16.msra.mxu1 %v2650_v33 }
 0xbfc   :  { %2520 = vmatprep.subr.bf16.mxu1 %v2745_v56 }
 0xbff   :  { %2521 = vmatpush3.bf16.msra.mxu1 %v2651_v38 }
 0xc00   :  { %2522 = vmatprep.subr.bf16.mxu1 %v2745_v56 }
 0xc03   :  { %2523 = vmatpush3.bf16.msra.mxu1 %v2652_v39 }
 0xc04   :  { %2524 = vmatprep.subr.bf16.mxu1 %v2745_v56 }
 0xc07   :  { %2525 = vmatpush3.bf16.msra.mxu1 %v2653_v49 }
 0xc08   :  { %2526 = vmatprep.subr.bf16.mxu1 %v2745_v56 }
 0xc0b   :  { %2527 = vmatpush3.bf16.msra.mxu1 %v2654_v50 }
 0xcc1   :  { %v1909_v43 = vpop.f32.mrb[28].mxu1 }
 0xcc2   :  { %v1910_v44 = vadd.f32 %v1909_v43, %v1826_v42  ;;  %v2490_v45 = vpop.f32.mrb[29].mxu1 }
 0xcc3   :  { %v1912_v46 = vpop.f32.mrb[30].mxu1 }
 0xcc4   :  { %v1915_v47 = vpack.c.bf16 %v1910_v44, %v1910_v44  ;;  %v2491_v48 = vpop.f32.mrb[31].mxu1 }
 0xcc6   :  { %2509 = vmatmul.mubr.bf16.vlgmr.msra.gmra.mrb[60].mxu0 %v1915_v47 }
 0xd99   :  { %v2018_v53 = vpop.f32.mrb[60].mxu0 }
 0xd9a   :  { %v2019_v54 = vadd.f32 %v2018_v53, %v1935_v52  ;;  %v2510_v55 = vpop.f32.mrb[61].mxu0 }
 0xd9b   :  { %v2021_v58 = vpop.f32.mrb[62].mxu0 }
 0xd9c   :  { %v2024_v59 = vmax.f32 %v2019_v54, 0.0  ;;  %v2511_v60 = vpop.f32.mrb[63].mxu0 }
 0xd9e   :  { %v2025_v61 = vpack.c.bf16 %v2024_v59, %v2024_v59 }
 0xda0   :  { %2529 = vmatmul.mubr.bf16.vlgmr.msra.gmra.mrb[32].mxu1 %v2025_v61 }
 0xe73   :  { %v2128_v56 = vpop.f32.mrb[32].mxu1 }
 0xe74   :  { %v2129_v0 = vadd.f32 %v2128_v56, %v2045_v63  ;;  %v2530_v1 = vpop.f32.mrb[33].mxu1 }
 0xe75   :  { %v2131_v2 = vpop.f32.mrb[34].mxu1 }
 0xe76   :  { %2134 = vst [vmem:[#allocation2] sm:$0x3] %v2129_v0  ;;  %v2531_v3 = vpop.f32.mrb[35].mxu1 }
 0xe77   :  { %2731 = shalt.err (!%p2728_p4)
}
 0xe78   :  { %s2732_s18 = scalar_lea.hbm %s3346_s10, 32 }
 0xe79   :  { %p2733_p5 = scmp.ne.s32.totalorder %s3346_s10, %s2732_s18  ;;  %p2736_p6 = scmp.lt.u32.totalorder %s2732_s18, %s3346_s10 }
 0xe7b   :  { %p2738_p7 = pnand %p2736_p6, %p2733_p5 }
 0xe7d   :  { %2741 = shalt.err (!%p2738_p7)
}
 0xe7e   :  { %2144 = dma.vmem_to_hbm [thread:$0]  %s2142_s15, 32, %s3346_s10, [#allocation3]  }
 0xe7f   :  { %2742 = dma.done.wait [#allocation3], 32  }
 0xe80   :  { %2743 = vsyncadd [#allocation3], 4294967264 }
 0xe81   :  { %2148 = vsyncpa [#allocation3], 1 }

</bundles_post_ra>
